<compile_context>
chip_gen: v7x
topology: tpu7x:2x2x1
jax: 0.10.0
libtpu: 0.0.40
codegen_flags: <defaults>
</compile_context>

<pallas_src>
import functools

import numpy as np
import jax
import jax.numpy as jnp
from jax import lax
from jax.experimental import pallas as pl
from jax.experimental.pallas import tpu as pltpu


# ----------------------------------------------------------------------------
# Fused kernel: pseudo-distance -> row softmax -> neg = score @ v
# ----------------------------------------------------------------------------
def _cycle_fused_kernel(u_ref, v_ref, neg_ref, *, coef, u_rows):
    """One U row-block per grid step.

    v_ref holds the FULL v slab (V, F): its index_map is constant, so Pallas
    DMAs it from HBM once for the whole grid and it stays VMEM-resident for
    both the distance and the mixing matmul.  u/neg stream per block.

    The true squared distance is ||u||^2 + ||v||^2 - 2 u.v ; the ||u||^2 term
    is constant per softmax row (axis=1) and cancels, so it is never computed.
    """
    v_f32 = v_ref[...].astype(jnp.float32)           # (V,  F) resident slab
    u_bf = u_ref[...].astype(jnp.bfloat16)            # (tu, F) streamed block
    v_bf = v_f32.astype(jnp.bfloat16)
    f = v_f32.shape[1]

    # ||v_b||^2 as a lane-major (1, V) row in f32 (MXU ones-trick); recomputed
    # per block from resident v — free in the HBM-bound regime (see header).
    ones_row = jnp.ones((1, f), jnp.float32)
    v_sq = lax.dot_general(ones_row, v_f32 * v_f32, (((1,), (1,)), ((), ())),
                           preferred_element_type=jnp.float32)           # (1, V)

    # u . v^T on the MXU (bf16 operands, f32 accumulation).
    cross = lax.dot_general(u_bf, v_bf, (((1,), (1,)), ((), ())),
                            preferred_element_type=jnp.float32)          # (tu, V)

    # Pseudo-distance (||u||^2 dropped; per-row shift is softmax-safe).
    dist = (v_sq - 2.0 * cross) * coef                                   # (tu, V)

    # Mask rows past the true U: the ragged last block reads stale VMEM which
    # could hold inf/NaN bit patterns.  Masked rows' outputs are dropped.
    tu = dist.shape[0]
    row = pl.program_id(0) * tu + lax.broadcasted_iota(jnp.int32, (tu, 1), 0)
    dist = jnp.where(row < u_rows, dist, 0.0)

    # Row softmax; divide goes to the EUP via approx reciprocal.
    m = jnp.max(dist, axis=1, keepdims=True)
    p = jnp.exp(dist - m)
    s = jnp.sum(p, axis=1, keepdims=True)
    score = (p * pl.reciprocal(s, approx=True)).astype(jnp.bfloat16)     # (tu, V)

    # neg = score @ v straight from the resident v (no second HBM read of v,
    # no HBM round trip for score).  Lane-dense (F = 12544) bf16 output stores.
    neg = lax.dot_general(score, v_bf, (((1,), (0,)), ((), ())),
                          preferred_element_type=jnp.float32)            # (tu, F)
    neg_ref[...] = neg.astype(neg_ref.dtype)


_VMEM_SOFT_LIMIT = 48 * 1024 * 1024   # safe on v7x (64 MiB/TC) and v5e/v6e


def _round_up(x, m):
    return ((x + m - 1) // m) * m


def _choose_tiling(u_rows, v_rows, f_dim, max_tu=256):
    """Pick the u row-block size from the VMEM budget (double-buffered blocks)."""
    resident_v = 2 * v_rows * f_dim * 4           # v slab, f32, double-buffered
    per_row = f_dim * (2 * 4 + 2 * 2)             # u f32 x2 bufs + neg bf16 x2
    vmem_limit = _VMEM_SOFT_LIMIT
    budget = vmem_limit - resident_v - (4 << 20)  # slack for sems/descriptors
    if budget < per_row * 8:
        # Very large V: the resident slab dominates; give XLA more scoped VMEM
        # (still within v5e/v6e's 128 MiB).  TODO(synk): beyond that the v slab
        # must be chunked with an online softmax (flash style) — not needed for
        # this module (topk == 100 rows per group).
        vmem_limit = min(resident_v + per_row * 8 + (8 << 20), 100 << 20)
        budget = vmem_limit - resident_v - (4 << 20)
    cap = max(8, min(max_tu, (budget // per_row) // 8 * 8))
    if u_rows < 64 and u_rows <= cap:
        tu = u_rows                                # single full-extent block
    else:
        # >= 2 row-blocks so the "parallel" grid axis can shard across the two
        # TensorCores on v7x; multiple of 8 (sublane tiling).
        tu = min(cap, _round_up(pl.cdiv(u_rows, 2), 8))
    return int(tu), int(vmem_limit)


def cycle_mix(feat_u, feat_v, coef):
    """neg = softmax(||u_a - v_b||^2 * coef, axis=1) @ v in one fused pallas_call.

    feat_u: (U, F) f32, feat_v: (V, F) f32.  Returns neg: (U, F) bf16.
    """
    U, F = feat_u.shape
    V, F2 = feat_v.shape
    assert F == F2 and U > 0 and V > 0

    tu, vmem_limit = _choose_tiling(U, V, F)
    n_u = pl.cdiv(U, tu)

    kernel = functools.partial(_cycle_fused_kernel, coef=float(coef), u_rows=U)
    flops = 4 * U * V * F                           # two MXU contractions
    bytes_accessed = 4 * F * (U + V) + 2 * U * F    # f32 reads + bf16 write

    return pl.pallas_call(
        kernel,
        out_shape=jax.ShapeDtypeStruct((U, F), jnp.bfloat16),
        grid_spec=pltpu.PrefetchScalarGridSpec(
            num_scalar_prefetch=0,
            grid=(n_u,),
            in_specs=[
                # u: streamed f32 row-blocks (bf16 cast happens in-kernel).
                pl.BlockSpec((tu, F), lambda i: (i, 0)),
                # v: full slab, constant index_map -> fetched from HBM once and
                # kept VMEM-resident across the grid.
                # TODO(synk): pipeline_mode=pl.Buffered(1) would halve its VMEM
                # footprint (it is only ever fetched once); left out pending
                # verification that buffer_count=1 lowers on all target chips.
                pl.BlockSpec((V, F), lambda i: (0, 0)),
            ],
            out_specs=pl.BlockSpec((tu, F), lambda i: (i, 0)),
        ),
        compiler_params=pltpu.CompilerParams(
            dimension_semantics=("parallel",),       # both TCs on v7x when n_u>=2
            vmem_limit_bytes=vmem_limit,
        ),
        cost_estimate=pl.CostEstimate(
            flops=int(flops),
            transcendentals=int(U * V),
            bytes_accessed=int(bytes_accessed)),
    )(feat_u, feat_v)


# ----------------------------------------------------------------------------
# Module wrapper (glue in plain JAX, hot path in the fused Pallas kernel)
# ----------------------------------------------------------------------------
class CycleEnergyDirectAddNoHeadPallas:
    FEAT_DIM = 256 * 49  # hard-coded in the PyTorch forward (.view(-1, 256*49))

    def __init__(self, coef=1e-4, scale=0.1):
        self.name = "cycle"
        self.input = "ROI"
        self.coef = float(coef)    # cfg.MODEL.SS.COEF
        self.scale = float(scale)  # cfg.MODEL.SS.LOSS_SCALE
        self.topk = 100

    def forward(self, features, idxs, proposals=None, prev_boxes=None):
        # TODO(synk): prev_boxes branch not implemented — the reference module
        # uses self.enc1 which is never defined in its __init__.
        assert prev_boxes is None
        n = features.shape[0]
        f_dim = int(np.prod(features.shape[1:]))
        assert f_dim == self.FEAT_DIM
        feats2d = features.reshape(n, f_dim)

        total_loss = jnp.zeros((1,), jnp.float32)
        corrects = 0
        counts = 0
        pos_list, neg_list = [], []
        prev = 0
        # TODO(synk): batching all (u, v) groups into ONE scalar-prefetch kernel
        # (review item) was evaluated and deliberately deferred: group row
        # offsets are not tile-aligned, so a BlockSpec-indexable packed layout
        # needs a padded repack that roughly doubles HBM traffic on this
        # bandwidth-bound op; the zero-copy alternative is a manual-DMA gather
        # (memory_space=pl.ANY + make_async_copy at unaligned row offsets).
        for i in range(0, len(idxs), 2):
            lo, mid, hi = prev, int(idxs[i]), int(idxs[i + 1])
            prev = hi
            u_rows = mid - lo
            v_rows = hi - mid
            if u_rows == 0:
                loss = feats2d[lo:mid].sum()     # mirrors torch `u.sum()` (== 0)
                total_loss = total_loss + loss * 0
                continue
            if v_rows == 0:
                # torch: softmax over an empty dim then matmul -> zeros (U, F).
                neg = jnp.zeros((u_rows, f_dim), jnp.bfloat16)
            else:
                neg = cycle_mix(feats2d[lo:mid], feats2d[mid:hi], self.coef)
            # computer_corr_softmax returns (zeros(1), 0, 0, score)
            loss = jnp.zeros((1,), jnp.float32)
            correct, cnt = 0, 0
            pos_list.append(feats2d[lo:mid])     # pos_fea = u, kept exact (f32)
            neg_list.append(neg)                 # bf16; upcast once at the concat
            total_loss = total_loss + loss * cnt
            corrects += correct
            counts += cnt

        if counts != 0:
            total_loss = total_loss / counts
            total_acc = corrects / counts
        else:
            total_acc = 0.0

        if pos_list:
            pos_fea = jnp.concatenate(pos_list, axis=0)
            neg_fea = jnp.concatenate(neg_list, axis=0).astype(pos_fea.dtype)
            assert pos_fea.shape[0] == neg_fea.shape[0]
            out = jnp.concatenate([pos_fea, neg_fea], axis=0)
            return {"loss_cycle": total_loss * self.scale}, total_acc, out
        return {"loss_cycle": total_loss * self.scale}, total_acc, None


# ----------------------------------------------------------------------------
# Pure-JAX reference (mirrors the PyTorch math, direct diff formulation, f32)
# ----------------------------------------------------------------------------
def ref_forward(features, idxs, coef):
    n = features.shape[0]
    feats2d = features.reshape(n, -1)
    pos_list, neg_list = [], []
    prev = 0
    for i in range(0, len(idxs), 2):
        u = feats2d[prev:idxs[i]]
        v = feats2d[idxs[i]:idxs[i + 1]]
        prev = idxs[i + 1]
        diff = u[:, None, :] - v[None, :, :]
        dist = jnp.sum(diff * diff, axis=-1) * coef
        score = jax.nn.softmax(dist, axis=1)
        pos_list.append(u)
        neg_list.append(score @ v)
    pos_fea = jnp.concatenate(pos_list, axis=0)
    neg_fea = jnp.concatenate(neg_list, axis=0)
    return jnp.concatenate([pos_fea, neg_fea], axis=0)


if __name__ == "__main__":
    key = jax.random.PRNGKey(0)
    C, H, W = 256, 7, 7                  # forward hard-codes the 256*49 flatten
    module = CycleEnergyDirectAddNoHeadPallas(coef=1e-4, scale=0.1)

    def run_case(group_sizes, subkey):
        idxs = list(np.cumsum(group_sizes))        # [u0, v0, u1, v1] row counts
        N = int(sum(group_sizes))
        features = jax.random.normal(subkey, (N, C, H, W), dtype=jnp.float32)

        loss_dict, acc, out = module.forward(features, idxs)
        out = jax.block_until_ready(out)
        loss = jax.block_until_ready(loss_dict["loss_cycle"])

        # Shape / semantics checks.
        n_u_total = group_sizes[0] + group_sizes[2]
        assert out.shape == (2 * n_u_total, C * H * W)
        assert loss.shape == (1,)
        assert float(loss[0]) == 0.0 and acc == 0.0

        # Numerical check vs pure-JAX f32 reference (kernel uses bf16 MXU ops
        # and a bf16 output stream).
        ref = jax.block_until_ready(ref_forward(features, idxs, 1e-4))
        np.testing.assert_allclose(np.asarray(out), np.asarray(ref),
                                   rtol=2e-2, atol=2e-2)

    k1, k2 = jax.random.split(key)
    # Tiny case: single full-extent block per group.
    run_case([4, 3, 3, 2], k1)
    # Larger case: group 0 has U=70 -> two u row-blocks (tu=40, ragged last
    # block), exercising the row mask and the "parallel" grid axis.
    run_case([70, 20, 5, 9], k2)

    print("KERNEL_OK")
</pallas_src>

<mosaic_0001>
module attributes {stable_mosaic.version = 11 : i64} {
  func.func @_cycle_fused_kernel(%arg0: i32, %arg1: memref<4x12544xf32, #tpu.memory_space<vmem>>, %arg2: memref<3x12544xf32, #tpu.memory_space<vmem>>, %arg3: memref<4x12544xbf16, #tpu.memory_space<vmem>>) attributes {dimension_semantics = [#tpu.dimension_semantics<parallel>], iteration_bounds = array<i64: 1>, scalar_prefetch = 0 : i64, scratch_operands = 0 : i64, tpu.core_type = #tpu.core_type<tc>, window_params = [{transform_indices = @transform_0, window_bounds = array<i64: 4, 12544>}, {pipeline_mode = #tpu.pipeline_mode<synchronous>, transform_indices = @transform_1, window_bounds = array<i64: 3, 12544>}, {transform_indices = @transform_2, window_bounds = array<i64: 4, 12544>}]} {
    %c0 = arith.constant 0 : index
    %c0_0 = arith.constant 0 : index
    %0 = vector.load %arg2[%c0, %c0_0] : memref<3x12544xf32, #tpu.memory_space<vmem>>, vector<3x12544xf32>
    %c0_1 = arith.constant 0 : index
    %c0_2 = arith.constant 0 : index
    %1 = vector.load %arg1[%c0_1, %c0_2] : memref<4x12544xf32, #tpu.memory_space<vmem>>, vector<4x12544xf32>
    %2 = arith.truncf %1 : vector<4x12544xf32> to vector<4x12544xbf16>
    %3 = arith.truncf %0 : vector<3x12544xf32> to vector<3x12544xbf16>
    %cst = arith.constant 1.000000e+00 : f32
    %4 = vector.broadcast %cst : f32 to vector<1x12544xf32>
    %5 = arith.mulf %0, %0 : vector<3x12544xf32>
    %cst_3 = arith.constant dense<0.000000e+00> : vector<1x3xf32>
    %6 = tpu.matmul %4, %5, %cst_3 {dimension_numbers = #tpu.dot_dimension_numbers<[1], [1], [0], [0], [0, 0, 1, 0], [], []>} : vector<1x12544xf32>, vector<3x12544xf32>, vector<1x3xf32> -> vector<1x3xf32>
    %cst_4 = arith.constant dense<0.000000e+00> : vector<4x3xf32>
    %7 = tpu.matmul %2, %3, %cst_4 {dimension_numbers = #tpu.dot_dimension_numbers<[1], [1], [0], [0], [0, 0, 1, 0], [], []>} : vector<4x12544xbf16>, vector<3x12544xbf16>, vector<4x3xf32> -> vector<4x3xf32>
    %cst_5 = arith.constant 2.000000e+00 : f32
    %8 = vector.broadcast %cst_5 : f32 to vector<4x3xf32>
    %9 = arith.mulf %8, %7 : vector<4x3xf32>
    %10 = vector.broadcast %6 : vector<1x3xf32> to vector<4x3xf32>
    %11 = arith.subf %10, %9 : vector<4x3xf32>
    %cst_6 = arith.constant 9.99999974E-5 : f32
    %12 = vector.broadcast %cst_6 : f32 to vector<4x3xf32>
    %13 = arith.mulf %11, %12 : vector<4x3xf32>
    %c4_i32 = arith.constant 4 : i32
    %14 = arith.muli %arg0, %c4_i32 : i32
    %15 = tpu.iota {dimensions = array<i32: 0>} : vector<4x1xi32>
    %16 = vector.broadcast %14 : i32 to vector<4x1xi32>
    %17 = arith.addi %16, %15 : vector<4x1xi32>
    %c4_i32_7 = arith.constant 4 : i32
    %18 = vector.broadcast %c4_i32_7 : i32 to vector<4x1xi32>
    %19 = arith.cmpi slt, %17, %18 : vector<4x1xi32>
    %cst_8 = arith.constant 0.000000e+00 : f32
    %20 = vector.shape_cast %19 : vector<4x1xi1> to vector<4x1xi1>
    %21 = vector.broadcast %20 : vector<4x1xi1> to vector<4x3xi1>
    %22 = vector.broadcast %cst_8 : f32 to vector<4x3xf32>
    %23 = arith.select %21, %13, %22 : vector<4x3xi1>, vector<4x3xf32>
    %cst_9 = arith.constant dense<0xFF800000> : vector<4xf32>
    %24 = vector.multi_reduction <maximumf>, %23, %cst_9 [1] : vector<4x3xf32> to vector<4xf32>
    %25 = vector.shape_cast %24 : vector<4xf32> to vector<4x1xf32>
    %26 = vector.broadcast %25 : vector<4x1xf32> to vector<4x3xf32>
    %27 = arith.subf %23, %26 : vector<4x3xf32>
    %28 = math.exp %27 : vector<4x3xf32>
    %cst_10 = arith.constant dense<0.000000e+00> : vector<4xf32>
    %29 = vector.multi_reduction <add>, %28, %cst_10 [1] : vector<4x3xf32> to vector<4xf32>
    %30 = vector.shape_cast %29 : vector<4xf32> to vector<4x1xf32>
    %31 = tpu.reciprocal %30 {approx = true} : vector<4x1xf32> -> vector<4x1xf32>
    %32 = vector.broadcast %31 : vector<4x1xf32> to vector<4x3xf32>
    %33 = arith.mulf %28, %32 : vector<4x3xf32>
    %34 = arith.truncf %33 : vector<4x3xf32> to vector<4x3xbf16>
    %cst_11 = arith.constant dense<0.000000e+00> : vector<4x12544xf32>
    %35 = tpu.matmul %34, %3, %cst_11 {dimension_numbers = #tpu.dot_dimension_numbers<[1], [0], [0], [1], [0, 0, 1, 1], [], []>} : vector<4x3xbf16>, vector<3x12544xbf16>, vector<4x12544xf32> -> vector<4x12544xf32>
    %36 = arith.truncf %35 : vector<4x12544xf32> to vector<4x12544xbf16>
    %c0_12 = arith.constant 0 : index
    %c0_13 = arith.constant 0 : index
    %37 = vector.load %arg3[%c0_12, %c0_13] : memref<4x12544xbf16, #tpu.memory_space<vmem>>, vector<4x12544xbf16>
    tpu.vector_store %arg3[%c0_12, %c0_13], %36 {strides = array<i32>} : memref<4x12544xbf16, #tpu.memory_space<vmem>>, vector<4x12544xbf16>,
    return
  }
  func.func @transform_0(%arg0: i32) -> (i32, i32) {
    %c0_i32 = arith.constant 0 : i32
    %c0_i32_0 = arith.constant 0 : i32
    return %arg0, %c0_i32 : i32, i32
  }
  func.func @transform_1(%arg0: i32) -> (i32, i32) {
    %c0_i32 = arith.constant 0 : i32
    %c0_i32_0 = arith.constant 0 : i32
    %c0_i32_1 = arith.constant 0 : i32
    return %c0_i32, %c0_i32_0 : i32, i32
  }
  func.func @transform_2(%arg0: i32) -> (i32, i32) {
    %c0_i32 = arith.constant 0 : i32
    %c0_i32_0 = arith.constant 0 : i32
    return %arg0, %c0_i32 : i32, i32
  }
}

</mosaic_0001>

<bundles_post_ra>
// kernel: tpu_custom_call.1
= control target key start
LH: loop header
LB: loop body
LE: loop exit
PB: predicated region body
PF: predicated region fallthrough
CT: control target
= control target key end

     0   :  { %7 = vsyncpa [#allocation3], 0  ;;  %s11092_s0 = inlined_call_operand.hbm [shape: f32[4,12544], index: 0, kind: input, shape index: {}]   ;;  %s11093_s1 = inlined_call_operand.hbm [shape: f32[3,12544], index: 1, kind: input, shape index: {}]   ;;  %s11094_s2 = inlined_call_operand.hbm [shape: bf16[4,12544], index: 2, kind: output, shape index: {}]  }
   0x1   :  { %8 = vsyncpa [#allocation6], 0 }
   0x2   :  { %9 = vsyncpa [#allocation4], 0  ;;  %s9797_s9 = smov [#allocation2]   ;;  %s9798_s11 = smov [#allocation5]  }
   0x3   :  { %s16_s10 = sshll.u32 %s9797_s9, 4  ;;  %s26_s12 = sshll.u32 %s9798_s11, 4  ;;  %s17_s10 = int_to_ptr.vmem [resolvable:$true] %s16_s10  ;;  %s27_s12 = int_to_ptr.vmem [resolvable:$true] %s26_s12 }
   0x4   :  { %s9725_s15 = scalar_lea.hbm %s11092_s0, 6272 }
   0x5   :  { %p9726_p0 = scmp.ne.s32.totalorder %s11092_s0, %s9725_s15  ;;  %p9729_p1 = scmp.lt.u32.totalorder %s9725_s15, %s11092_s0 }
   0x7   :  { %p9731_p2 = pnand %p9729_p1, %p9726_p0 }
   0x9   :  { %9734 = shalt.err (!%p9731_p2)
}
   0xa   :  { %s9735_s20 = scalar_lea.vmem %s17_s10, 6272  ;;  %p9740_p4 = scmp.lt.s32.totalorder %s17_s10, %s17_s10 }
   0xb   :  { %p9736_p3 = scmp.ne.s32.totalorder %s17_s10, %s9735_s20  ;;  %p9741_p5 = scmp.lt.s32.totalorder %s9735_s20, %s9735_s20 }
   0xd   :  { %p9742_p6 = por %p9741_p5, %p9740_p4 }
   0xf   :  { %p9743_p7 = pnand %p9742_p6, %p9736_p3 }
  0x11   :  { %9746 = shalt.err (!%p9743_p7)
}
  0x12   :  { %19 = dma.hbm_to_vmem [thread:$0]  %s11092_s0, 6272, %s17_s10, [#allocation3]  }
  0x13   :  { %s9747_s25 = scalar_lea.hbm %s11093_s1, 6272 }
  0x14   :  { %p9748_p8 = scmp.ne.s32.totalorder %s11093_s1, %s9747_s25  ;;  %p9751_p9 = scmp.lt.u32.totalorder %s9747_s25, %s11093_s1 }
  0x16   :  { %p9753_p10 = pnand %p9751_p9, %p9748_p8 }
  0x18   :  { %9756 = shalt.err (!%p9753_p10)
}
  0x19   :  { %s9757_s30 = scalar_lea.vmem %s27_s12, 6272  ;;  %p9762_p12 = scmp.lt.s32.totalorder %s27_s12, %s27_s12 }
  0x1a   :  { %p9758_p11 = scmp.ne.s32.totalorder %s27_s12, %s9757_s30  ;;  %p9763_p13 = scmp.lt.s32.totalorder %s9757_s30, %s9757_s30 }
  0x1c   :  { %p9764_p0 = por %p9763_p13, %p9762_p12 }
  0x1e   :  { %p9765_p1 = pnand %p9764_p0, %p9758_p11 }
  0x20   :  { %9768 = shalt.err (!%p9765_p1)
}
  0x21   :  { %29 = dma.hbm_to_vmem [thread:$0]  %s11093_s1, 6272, %s27_s12, [#allocation6]  }
  0x22   :  { %9791 = dma.done.wait [#allocation3], 6272  }
  0x23   :  { %9792 = vsyncadd [#allocation3], 4294961024 }
  0x24   :  { %9793 = dma.done.wait [#allocation6], 6272  }
  0x25   :  { %9794 = vsyncadd [#allocation6], 4294961024  ;;  %v9799_v0 = vmov 1.0   ;;  %v37_v1 = vld [vmem:[#allocation5] sm:$0x77]  ;;  %v86_v2 = vld [vmem:[#allocation2] sm:$0xff] }
  0x26   :  { %885 = vmatprep.mubr.f32.mxu0 %v9799_v0  ;;  %v38_v3 = vld [vmem:[#allocation5 + $0x8] sm:$0x77]  ;;  %v625_v4 = vmul.f32 %v37_v1, %v37_v1  ;;  %v429_v5 = vcombine.high %v37_v1, %v37_v1  ;;  %v184_v6 = vcombine.high %v86_v2, %v86_v2  ;;  %v39_v7 = vld [vmem:[#allocation5 + $0x10] sm:$0x77]  ;;  %v9844_v8 = vpack.c.bf16 %v37_v1, %v37_v1  ;;  %v87_v14 = vld [vmem:[#allocation2 + $0x8] sm:$0xff]  ;;  %s9803_s1 = smov [#allocation7]  }
  0x27   :  { %v626_v9 = vmul.f32 %v38_v3, %v38_v3  ;;  %v430_v10 = vcombine.high %v38_v3, %v38_v3  ;;  %v627_v17 = vmul.f32 %v39_v7, %v39_v7  ;;  %v185_v18 = vcombine.high %v87_v14, %v87_v14  ;;  %v40_v21 = vld [vmem:[#allocation5 + $0x18] sm:$0x77]  ;;  %v88_v28 = vld [vmem:[#allocation2 + $0x10] sm:$0xff]  ;;  %v41_v29 = vld [vmem:[#allocation5 + $0x20] sm:$0x77]  ;;  %s9219_s4 = sshll.u32 %s9803_s1, 4  ;;  %s9220_s4 = int_to_ptr.vmem [resolvable:$true] %s9219_s4 }
  0x28   :  { %v723_v11 = vcombine.high %v625_v4, %v625_v4  ;;  %v9846_v12 = vpack.c.bf16 %v429_v5, %v429_v5  ;;  %v283_v13 = vpack.c.bf16 %v184_v6, %v184_v6  ;;  %v431_v20 = vcombine.high %v39_v7, %v39_v7  ;;  %v42_v38 = vld [vmem:[#allocation5 + $0x28] sm:$0x77]  ;;  %v89_v40 = vld [vmem:[#allocation2 + $0x18] sm:$0xff]  ;;  %v90_v51 = vld [vmem:[#allocation2 + $0x20] sm:$0xff]  ;;  %s9769_s5 = scalar_lea.vmem %s9220_s4, 3136  ;;  %p9774_p3 = scmp.lt.s32.totalorder %s9220_s4, %s9220_s4 }
  0x29   :  { %v724_v15 = vcombine.high %v626_v9, %v626_v9  ;;  %v9848_v16 = vpack.c.bf16 %v430_v10, %v430_v10  ;;  %v725_v19 = vcombine.high %v627_v17, %v627_v17  ;;  %v282_v22 = vpack.c.bf16 %v86_v2, %v86_v2  ;;  %v9871_v44 = vld [vmem:[#allocation5 + $0x30] sm:$0x77]  ;;  %v9884_v52 = vld [vmem:[#allocation5 + $0x38] sm:$0x77]  ;;  %v9893_v61 = vld [vmem:[#allocation5 + $0x40] sm:$0x77]  ;;  %p9770_p2 = scmp.ne.s32.totalorder %s9220_s4, %s9769_s5  ;;  %p9775_p4 = scmp.lt.s32.totalorder %s9769_s5, %s9769_s5 }
  0x2a   :  { %821 = vmatprep.subr.mxu0 %v723_v11  ;;  %4251 = vmatprep.subr.bf16.mxu1 %v9846_v12  ;;  %v9854_v23 = vpack.c.bf16 %v38_v3, %v38_v3  ;;  %v285_v24 = vpack.c.bf16 %v185_v18, %v185_v18  ;;  %v9857_v25 = vpack.c.bf16 %v431_v20, %v431_v20  ;;  %v91_v63 = vld [vmem:[#allocation2 + $0x28] sm:$0xff]  ;;  %vm6244_vm0 = vcmask 1040384  }
  0x2b   :  { %822 = vmatpush1.xpose.msra.mxu0 %v625_v4  ;;  %4252 = vmatpush1.bf16.xpose.msra.mxu1 %v9844_v8  ;;  %v628_v26 = vmul.f32 %v40_v21, %v40_v21  ;;  %v186_v30 = vcombine.high %v88_v28, %v88_v28  ;;  %v629_v31 = vmul.f32 %v41_v29, %v41_v29  ;;  %v9903_v4 = vld [vmem:[#allocation5 + $0x48] sm:$0x77]  ;;  %vm6245_vm1 = vcmask 1041408   ;;  %p9776_p5 = por %p9775_p4, %p9774_p3 }
  0x2c   :  { %4283 = vmatprep.mubr.bf16.mxu1 %v283_v13  ;;  %891 = vmatprep.subr.mxu0 %v724_v15  ;;  %v432_v32 = vcombine.high %v40_v21, %v40_v21  ;;  %v284_v33 = vpack.c.bf16 %v87_v14, %v87_v14  ;;  %v9863_v34 = vpack.c.bf16 %v39_v7, %v39_v7  ;;  %v92_v13 = vld [vmem:[#allocation2 + $0x30] sm:$0xff]  ;;  %v9916_v14 = vld [vmem:[#allocation5 + $0x50] sm:$0x77]  ;;  %vm6227_vm3 = vcmask 19456  }
  0x2d   :  { %4291 = vmatprep.subr.bf16.mxu1 %v9848_v16  ;;  %v726_v27 = vcombine.high %v628_v26, %v628_v26  ;;  %v287_v35 = vpack.c.bf16 %v186_v30, %v186_v30  ;;  %v727_v36 = vcombine.high %v629_v31, %v629_v31  ;;  %v630_v39 = vmul.f32 %v42_v38, %v42_v38  ;;  %p9777_p6 = pnand %p9776_p5, %p9770_p2 }
  0x2e   :  { %886 = vmatmul.mubr.f32.vlgmr.msra.gmra.mrb[0].mxu0 %v9799_v0  ;;  %v9865_v37 = vpack.c.bf16 %v432_v32, %v432_v32  ;;  %v187_v41 = vcombine.high %v89_v40, %v89_v40  ;;  %v433_v43 = vcombine.high %v41_v29, %v41_v29  ;;  %v286_v45 = vpack.c.bf16 %v88_v28, %v88_v28  ;;  %v93_v28 = vld [vmem:[#allocation2 + $0x38] sm:$0xff]  ;;  %v9939_v32 = vld [vmem:[#allocation5 + $0x60] sm:$0x77] }
  0x2f   :  { %892 = vmatpush1.xpose.msra.mxu0 %v626_v9  ;;  %955 = vmatprep.mubr.f32.mxu0 %v9799_v0  ;;  %v728_v42 = vcombine.high %v630_v39, %v630_v39  ;;  %v9874_v46 = vpack.c.bf16 %v40_v21, %v40_v21  ;;  %v631_v49 = vmul.f32 %v9871_v44, %v9871_v44  ;;  %vm6240_vm4 = vcmask 23552  }
  0x30   :  { %961 = vmatprep.subr.mxu0 %v725_v19  ;;  %v289_v47 = vpack.c.bf16 %v187_v41, %v187_v41  ;;  %v9877_v48 = vpack.c.bf16 %v433_v43, %v433_v43  ;;  %v188_v53 = vcombine.high %v90_v51, %v90_v51  ;;  %v632_v54 = vmul.f32 %v9884_v52, %v9884_v52  ;;  %v94_v41 = vld [vmem:[#allocation2 + $0x40] sm:$0xff] }
  0x31   :  { %v729_v50 = vcombine.high %v631_v49, %v631_v49  ;;  %v434_v55 = vcombine.high %v42_v38, %v42_v38  ;;  %v288_v56 = vpack.c.bf16 %v89_v40, %v89_v40  ;;  %v9889_v57 = vpack.c.bf16 %v41_v29, %v41_v29 }
  0x32   :  { %4284 = vmatmul.mubr.bf16.vlgmr.msra.gmra.mrb[0].mxu1 %v282_v22  ;;  %v291_v58 = vpack.c.bf16 %v188_v53, %v188_v53  ;;  %v730_v59 = vcombine.high %v632_v54, %v632_v54  ;;  %v633_v62 = vmul.f32 %v9893_v61, %v9893_v61  ;;  %v189_v1 = vcombine.high %v91_v63, %v91_v63  ;;  %v9967_v53 = vld [vmem:[#allocation5 + $0x70] sm:$0x77] }
  0x33   :  { %4292 = vmatpush1.bf16.xpose.msra.mxu1 %v9854_v23  ;;  %4323 = vmatprep.mubr.bf16.mxu1 %v285_v24  ;;  %v9891_v60 = vpack.c.bf16 %v434_v55, %v434_v55  ;;  %v435_v3 = vcombine.high %v9871_v44, %v9871_v44  ;;  %v290_v5 = vpack.c.bf16 %v90_v51, %v90_v51  ;;  %v95_v55 = vld [vmem:[#allocation2 + $0x48] sm:$0xff] }
  0x34   :  { %4331 = vmatprep.subr.bf16.mxu1 %v9857_v25  ;;  %v731_v2 = vcombine.high %v633_v62, %v633_v62  ;;  %v9906_v6 = vpack.c.bf16 %v42_v38, %v42_v38  ;;  %v293_v7 = vpack.c.bf16 %v189_v1, %v189_v1  ;;  %v634_v10 = vmul.f32 %v9903_v4, %v9903_v4 }
  0x35   :  { %v9909_v9 = vpack.c.bf16 %v435_v3, %v435_v3  ;;  %v190_v15 = vcombine.high %v92_v13, %v92_v13  ;;  %v436_v18 = vcombine.high %v9884_v52, %v9884_v52  ;;  %v292_v19 = vpack.c.bf16 %v91_v63, %v91_v63 }
  0x36   :  { %956 = vmatmul.mubr.f32.vlgmr.msra.gmra.mrb[0].mxu0 %v9799_v0  ;;  %v732_v11 = vcombine.high %v634_v10, %v634_v10  ;;  %v9925_v20 = vpack.c.bf16 %v9871_v44, %v9871_v44  ;;  %v191_v29 = vcombine.high %v93_v28, %v93_v28  ;;  %v192_v43 = vcombine.high %v94_v41, %v94_v41 }
  0x37   :  { %962 = vmatpush1.xpose.msra.mxu0 %v627_v17  ;;  %1025 = vmatprep.mubr.f32.mxu0 %v9799_v0  ;;  %v635_v17 = vmul.f32 %v9916_v14, %v9916_v14  ;;  %v295_v21 = vpack.c.bf16 %v190_v15, %v190_v15  ;;  %v9927_v24 = vpack.c.bf16 %v436_v18, %v436_v18 }
  0x38   :  { %1031 = vmatprep.subr.mxu0 %v726_v27  ;;  %v9982_v63 = vpack.c.bf16 %v9903_v4, %v9903_v4  ;;  %v300_v15 = vpack.c.bf16 %v95_v55, %v95_v55 }
  0x39   :  { %v733_v22 = vcombine.high %v635_v17, %v635_v17 }
  0x3e   :  { %1026 = vmatmul.mubr.f32.vlgmr.msra.gmra.mrb[0].mxu0 %v9799_v0  ;;  %4324 = vmatmul.mubr.bf16.vlgmr.msra.gmra.mrb[0].mxu1 %v284_v33  ;;  %v294_v33 = vpack.c.bf16 %v92_v13, %v92_v13 }
  0x3f   :  { %4332 = vmatpush1.bf16.xpose.msra.mxu1 %v9863_v34  ;;  %1032 = vmatpush1.xpose.msra.mxu0 %v628_v26  ;;  %v9929_v26 = vld [vmem:[#allocation5 + $0x58] sm:$0x77] }
  0x40   :  { %1095 = vmatprep.mubr.f32.mxu0 %v9799_v0  ;;  %4363 = vmatprep.mubr.bf16.mxu1 %v287_v35  ;;  %v636_v27 = vmul.f32 %v9929_v26, %v9929_v26  ;;  %v9944_v35 = vpack.c.bf16 %v9884_v52, %v9884_v52  ;;  %v440_v13 = vcombine.high %v9929_v26, %v9929_v26 }
  0x41   :  { %1101 = vmatprep.subr.mxu0 %v727_v36  ;;  %4371 = vmatprep.subr.bf16.mxu1 %v9865_v37  ;;  %v297_v36 = vpack.c.bf16 %v191_v29, %v191_v29 }
  0x42   :  { %v734_v30 = vcombine.high %v636_v27, %v636_v27 }
  0x46   :  { %1096 = vmatmul.mubr.f32.vlgmr.msra.gmra.mrb[0].mxu0 %v9799_v0 }
  0x47   :  { %1102 = vmatpush1.xpose.msra.mxu0 %v629_v31  ;;  %1165 = vmatprep.mubr.f32.mxu0 %v9799_v0  ;;  %v437_v31 = vcombine.high %v9893_v61, %v9893_v61 }
  0x48   :  { %1171 = vmatprep.subr.mxu0 %v728_v42  ;;  %v9954_v42 = vld [vmem:[#allocation5 + $0x68] sm:$0x77] }
  0x49   :  { %v9947_v38 = vpack.c.bf16 %v437_v31, %v437_v31  ;;  %v638_v44 = vmul.f32 %v9954_v42, %v9954_v42  ;;  %v10015_v31 = vld [vmem:[#allocation5 + $0x90] sm:$0x77] }
  0x4a   :  { %4364 = vmatmul.mubr.bf16.vlgmr.msra.gmra.mrb[0].mxu1 %v286_v45  ;;  %v438_v45 = vcombine.high %v9903_v4, %v9903_v4  ;;  %v9992_v4 = vld [vmem:[#allocation5 + $0x80] sm:$0x77] }
  0x4b   :  { %4372 = vmatpush1.bf16.xpose.msra.mxu1 %v9874_v46  ;;  %4403 = vmatprep.mubr.bf16.mxu1 %v289_v47  ;;  %v296_v47 = vpack.c.bf16 %v93_v28, %v93_v28  ;;  %v736_v51 = vcombine.high %v638_v44, %v638_v44 }
  0x4c   :  { %4411 = vmatprep.subr.bf16.mxu1 %v9877_v48  ;;  %v9965_v52 = vpack.c.bf16 %v438_v45, %v438_v45 }
  0x4e   :  { %1166 = vmatmul.mubr.f32.vlgmr.msra.gmra.mrb[0].mxu0 %v9799_v0 }
  0x4f   :  { %1172 = vmatpush1.xpose.msra.mxu0 %v630_v39  ;;  %1235 = vmatprep.mubr.f32.mxu0 %v9799_v0  ;;  %v637_v39 = vmul.f32 %v9939_v32, %v9939_v32 }
  0x50   :  { %1241 = vmatprep.subr.mxu0 %v729_v50  ;;  %v299_v50 = vpack.c.bf16 %v192_v43, %v192_v43 }
  0x51   :  { %v735_v40 = vcombine.high %v637_v39, %v637_v39 }
  0x56   :  { %1236 = vmatmul.mubr.f32.vlgmr.msra.gmra.mrb[0].mxu0 %v9799_v0  ;;  %4404 = vmatmul.mubr.bf16.vlgmr.msra.gmra.mrb[0].mxu1 %v288_v56  ;;  %v193_v56 = vcombine.high %v95_v55, %v95_v55 }
  0x57   :  { %4412 = vmatpush1.bf16.xpose.msra.mxu1 %v9889_v57  ;;  %1242 = vmatpush1.xpose.msra.mxu0 %v631_v49  ;;  %v9963_v49 = vpack.c.bf16 %v9893_v61, %v9893_v61  ;;  %v9977_v61 = vld [vmem:[#allocation5 + $0x78] sm:$0x77] }
  0x58   :  { %1305 = vmatprep.mubr.f32.mxu0 %v9799_v0  ;;  %4443 = vmatprep.mubr.bf16.mxu1 %v291_v58  ;;  %v301_v1 = vpack.c.bf16 %v193_v56, %v193_v56  ;;  %v640_v3 = vmul.f32 %v9977_v61, %v9977_v61 }
  0x59   :  { %1311 = vmatprep.subr.mxu0 %v730_v59  ;;  %4451 = vmatprep.subr.bf16.mxu1 %v9891_v60  ;;  %v439_v59 = vcombine.high %v9916_v14, %v9916_v14 }
  0x5e   :  { %1306 = vmatmul.mubr.f32.vlgmr.msra.gmra.mrb[0].mxu0 %v9799_v0 }
  0x5f   :  { %1312 = vmatpush1.xpose.msra.mxu0 %v632_v54  ;;  %1375 = vmatprep.mubr.f32.mxu0 %v9799_v0  ;;  %v639_v54 = vmul.f32 %v9967_v53, %v9967_v53 }
  0x60   :  { %1381 = vmatprep.subr.mxu0 %v731_v2  ;;  %v9985_v2 = vpack.c.bf16 %v439_v59, %v439_v59  ;;  %v10043_v59 = vld [vmem:[#allocation5 + $0xa0] sm:$0x77] }
  0x61   :  { %v737_v58 = vcombine.high %v639_v54, %v639_v54 }
  0x62   :  { %4444 = vmatmul.mubr.bf16.vlgmr.msra.gmra.mrb[0].mxu1 %v290_v5  ;;  %v738_v5 = vcombine.high %v640_v3, %v640_v3 }
  0x63   :  { %4452 = vmatpush1.bf16.xpose.msra.mxu1 %v9906_v6  ;;  %4483 = vmatprep.mubr.bf16.mxu1 %v293_v7  ;;  %v96_v7 = vld [vmem:[#allocation2 + $0x50] sm:$0xff] }
  0x64   :  { %4491 = vmatprep.subr.bf16.mxu1 %v9909_v9 }
  0x66   :  { %1376 = vmatmul.mubr.f32.vlgmr.msra.gmra.mrb[0].mxu0 %v9799_v0 }
  0x67   :  { %1382 = vmatpush1.xpose.msra.mxu0 %v633_v62  ;;  %1445 = vmatprep.mubr.f32.mxu0 %v9799_v0  ;;  %v298_v62 = vpack.c.bf16 %v94_v41, %v94_v41  ;;  %v643_v41 = vmul.f32 %v10015_v31, %v10015_v31 }
  0x68   :  { %1451 = vmatprep.subr.mxu0 %v732_v11  ;;  %v641_v11 = vmul.f32 %v9992_v4, %v9992_v4 }
  0x69   :  { %v741_v43 = vcombine.high %v643_v41, %v643_v41 }
  0x6e   :  { %1446 = vmatmul.mubr.f32.vlgmr.msra.gmra.mrb[0].mxu0 %v9799_v0  ;;  %4484 = vmatmul.mubr.bf16.vlgmr.msra.gmra.mrb[0].mxu1 %v292_v19  ;;  %v739_v19 = vcombine.high %v641_v11, %v641_v11 }
  0x6f   :  { %4492 = vmatpush1.bf16.xpose.msra.mxu1 %v9925_v20  ;;  %1452 = vmatpush1.xpose.msra.mxu0 %v634_v10  ;;  %v194_v10 = vcombine.high %v96_v7, %v96_v7 }
  0x70   :  { %1515 = vmatprep.mubr.f32.mxu0 %v9799_v0  ;;  %4523 = vmatprep.mubr.bf16.mxu1 %v295_v21  ;;  %v10003_v21 = vpack.c.bf16 %v440_v13, %v440_v13 }
  0x71   :  { %1521 = vmatprep.subr.mxu0 %v733_v22  ;;  %4531 = vmatprep.subr.bf16.mxu1 %v9927_v24  ;;  %v303_v18 = vpack.c.bf16 %v194_v10, %v194_v10  ;;  %v10005_v22 = vld [vmem:[#allocation5 + $0x88] sm:$0x77] }
  0x76   :  { %1516 = vmatmul.mubr.f32.vlgmr.msra.gmra.mrb[0].mxu0 %v9799_v0 }
  0x77   :  { %1522 = vmatpush1.xpose.msra.mxu0 %v635_v17  ;;  %1585 = vmatprep.mubr.f32.mxu0 %v9799_v0  ;;  %v10001_v17 = vpack.c.bf16 %v9916_v14, %v9916_v14  ;;  %v97_v14 = vld [vmem:[#allocation2 + $0x58] sm:$0xff] }
  0x78   :  { %1591 = vmatprep.subr.mxu0 %v734_v30  ;;  %v195_v28 = vcombine.high %v97_v14, %v97_v14  ;;  %v441_v30 = vcombine.high %v9939_v32, %v9939_v32 }
  0x7a   :  { %4524 = vmatmul.mubr.bf16.vlgmr.msra.gmra.mrb[0].mxu1 %v294_v33  ;;  %v302_v33 = vpack.c.bf16 %v96_v7, %v96_v7  ;;  %v10053_v7 = vld [vmem:[#allocation5 + $0xa8] sm:$0x77] }
  0x7b   :  { %4532 = vmatpush1.bf16.xpose.msra.mxu1 %v9944_v35  ;;  %4563 = vmatprep.mubr.bf16.mxu1 %v297_v36  ;;  %v10020_v36 = vpack.c.bf16 %v9929_v26, %v9929_v26  ;;  %v10030_v26 = vld [vmem:[#allocation5 + $0x98] sm:$0x77] }
  0x7c   :  { %4571 = vmatprep.subr.bf16.mxu1 %v9947_v38 }
  0x7e   :  { %1586 = vmatmul.mubr.f32.vlgmr.msra.gmra.mrb[0].mxu0 %v9799_v0 }
  0x7f   :  { %1592 = vmatpush1.xpose.msra.mxu0 %v636_v27  ;;  %1655 = vmatprep.mubr.f32.mxu0 %v9799_v0  ;;  %v642_v27 = vmul.f32 %v10005_v22, %v10005_v22 }
  0x80   :  { %1661 = vmatprep.subr.mxu0 %v735_v40  ;;  %v10023_v40 = vpack.c.bf16 %v441_v30, %v441_v30 }
  0x81   :  { %v740_v29 = vcombine.high %v642_v27, %v642_v27 }
  0x82   :  { %11146 = vst [vmem:[#allocation11_spill] sm:$0xff] %v10023_v40 }
  0x86   :  { %1656 = vmatmul.mubr.f32.vlgmr.msra.gmra.mrb[0].mxu0 %v9799_v0  ;;  %4564 = vmatmul.mubr.bf16.vlgmr.msra.gmra.mrb[0].mxu1 %v296_v47  ;;  %v644_v47 = vmul.f32 %v10030_v26, %v10030_v26 }
  0x87   :  { %4572 = vmatpush1.bf16.xpose.msra.mxu1 %v9963_v49  ;;  %1662 = vmatpush1.xpose.msra.mxu0 %v637_v39  ;;  %v305_v39 = vpack.c.bf16 %v195_v28, %v195_v28 }
  0x88   :  { %1725 = vmatprep.mubr.f32.mxu0 %v9799_v0  ;;  %4603 = vmatprep.mubr.bf16.mxu1 %v299_v50  ;;  %v442_v50 = vcombine.high %v9954_v42, %v9954_v42  ;;  %v742_v56 = vcombine.high %v644_v47, %v644_v47 }
  0x89   :  { %1731 = vmatprep.subr.mxu0 %v736_v51  ;;  %4611 = vmatprep.subr.bf16.mxu1 %v9965_v52  ;;  %v304_v51 = vpack.c.bf16 %v97_v14, %v97_v14 }
  0x8e   :  { %1726 = vmatmul.mubr.f32.vlgmr.msra.gmra.mrb[0].mxu0 %v9799_v0 }
  0x8f   :  { %1732 = vmatpush1.xpose.msra.mxu0 %v638_v44  ;;  %1795 = vmatprep.mubr.f32.mxu0 %v9799_v0  ;;  %v98_v44 = vld [vmem:[#allocation2 + $0x60] sm:$0xff] }
  0x90   :  { %1801 = vmatprep.subr.mxu0 %v737_v58  ;;  %v196_v45 = vcombine.high %v98_v44, %v98_v44  ;;  %v10041_v58 = vpack.c.bf16 %v442_v50, %v442_v50  ;;  %v306_v10 = vpack.c.bf16 %v98_v44, %v98_v44  ;;  %v10081_v44 = vld [vmem:[#allocation5 + $0xb8] sm:$0x77] }
  0x92   :  { %4604 = vmatmul.mubr.bf16.vlgmr.msra.gmra.mrb[0].mxu1 %v298_v62  ;;  %v307_v55 = vpack.c.bf16 %v196_v45, %v196_v45  ;;  %11148 = vst [vmem:[#allocation13_spill] sm:$0xff] %v10041_v58  ;;  %v645_v62 = vmul.f32 %v10043_v59, %v10043_v59  ;;  %v648_v45 = vmul.f32 %v10081_v44, %v10081_v44 }
  0x93   :  { %4612 = vmatpush1.bf16.xpose.msra.mxu1 %v9982_v63  ;;  %4643 = vmatprep.mubr.bf16.mxu1 %v301_v1 }
  0x94   :  { %4651 = vmatprep.subr.bf16.mxu1 %v9985_v2  ;;  %v746_v50 = vcombine.high %v648_v45, %v648_v45 }
  0x96   :  { %1796 = vmatmul.mubr.f32.vlgmr.msra.gmra.mrb[0].mxu0 %v9799_v0 }
  0x97   :  { %1802 = vmatpush1.xpose.msra.mxu0 %v639_v54  ;;  %1865 = vmatprep.mubr.f32.mxu0 %v9799_v0  ;;  %v10039_v54 = vpack.c.bf16 %v9939_v32, %v9939_v32  ;;  %v99_v32 = vld [vmem:[#allocation2 + $0x68] sm:$0xff] }
  0x98   :  { %1871 = vmatprep.subr.mxu0 %v738_v5  ;;  %v197_v1 = vcombine.high %v99_v32, %v99_v32  ;;  %v443_v5 = vcombine.high %v9967_v53, %v9967_v53  ;;  %v308_v30 = vpack.c.bf16 %v99_v32, %v99_v32 }
  0x99   :  { %11147 = vst [vmem:[#allocation12_spill] sm:$0xff] %v10039_v54 }
  0x9a   :  { %v309_v13 = vpack.c.bf16 %v197_v1, %v197_v1 }
  0x9e   :  { %1866 = vmatmul.mubr.f32.vlgmr.msra.gmra.mrb[0].mxu0 %v9799_v0  ;;  %4644 = vmatmul.mubr.bf16.vlgmr.msra.gmra.mrb[0].mxu1 %v300_v15  ;;  %v10061_v15 = vpack.c.bf16 %v443_v5, %v443_v5 }
  0x9f   :  { %4652 = vmatpush1.bf16.xpose.msra.mxu1 %v10001_v17  ;;  %1872 = vmatpush1.xpose.msra.mxu0 %v640_v3  ;;  %v743_v3 = vcombine.high %v645_v62, %v645_v62 }
  0xa0   :  { %1935 = vmatprep.mubr.f32.mxu0 %v9799_v0  ;;  %4683 = vmatprep.mubr.bf16.mxu1 %v303_v18  ;;  %11150 = vst [vmem:[#allocation15_spill] sm:$0xff] %v10061_v15  ;;  %v646_v18 = vmul.f32 %v10053_v7, %v10053_v7 }
  0xa1   :  { %1941 = vmatprep.subr.mxu0 %v739_v19  ;;  %4691 = vmatprep.subr.bf16.mxu1 %v10003_v21 }
  0xa2   :  { %v744_v19 = vcombine.high %v646_v18, %v646_v18 }
  0xa6   :  { %1936 = vmatmul.mubr.f32.vlgmr.msra.gmra.mrb[0].mxu0 %v9799_v0 }
  0xa7   :  { %1942 = vmatpush1.xpose.msra.mxu0 %v641_v11  ;;  %2005 = vmatprep.mubr.f32.mxu0 %v9799_v0  ;;  %v10058_v11 = vpack.c.bf16 %v9954_v42, %v9954_v42  ;;  %v10068_v42 = vld [vmem:[#allocation5 + $0xb0] sm:$0x77] }
  0xa8   :  { %2011 = vmatprep.subr.mxu0 %v740_v29  ;;  %v647_v28 = vmul.f32 %v10068_v42, %v10068_v42  ;;  %v444_v29 = vcombine.high %v9977_v61, %v9977_v61 }
  0xa9   :  { %11149 = vst [vmem:[#allocation14_spill] sm:$0xff] %v10058_v11 }
  0xaa   :  { %4684 = vmatmul.mubr.bf16.vlgmr.msra.gmra.mrb[0].mxu1 %v302_v33  ;;  %v10077_v33 = vpack.c.bf16 %v9967_v53, %v9967_v53  ;;  %v101_v53 = vld [vmem:[#allocation2 + $0x78] sm:$0xff] }
  0xab   :  { %4692 = vmatpush1.bf16.xpose.msra.mxu1 %v10020_v36  ;;  %4723 = vmatprep.mubr.bf16.mxu1 %v305_v39 }
  0xac   :  { %4731 = vmatprep.subr.bf16.mxu1 %v10023_v40  ;;  %11151 = vst [vmem:[#allocation16_spill] sm:$0xff] %v10077_v33 }
  0xae   :  { %2006 = vmatmul.mubr.f32.vlgmr.msra.gmra.mrb[0].mxu0 %v9799_v0 }
  0xaf   :  { %2012 = vmatpush1.xpose.msra.mxu0 %v642_v27  ;;  %2075 = vmatprep.mubr.f32.mxu0 %v9799_v0  ;;  %v100_v27 = vld [vmem:[#allocation2 + $0x70] sm:$0xff] }
  0xb0   :  { %2081 = vmatprep.subr.mxu0 %v741_v43  ;;  %v198_v14 = vcombine.high %v100_v27, %v100_v27  ;;  %v10079_v43 = vpack.c.bf16 %v444_v29, %v444_v29 }
  0xb2   :  { %v311_v39 = vpack.c.bf16 %v198_v14, %v198_v14  ;;  %11152 = vst [vmem:[#allocation17_spill] sm:$0xff] %v10079_v43  ;;  %v10115_v14 = vpack.c.bf16 %v9992_v4, %v9992_v4 }
  0xb4   :  { %11155 = vst [vmem:[#allocation20_spill] sm:$0xff] %v10115_v14 }
  0xb6   :  { %2076 = vmatmul.mubr.f32.vlgmr.msra.gmra.mrb[0].mxu0 %v9799_v0  ;;  %4724 = vmatmul.mubr.bf16.vlgmr.msra.gmra.mrb[0].mxu1 %v304_v51  ;;  %v445_v51 = vcombine.high %v9992_v4, %v9992_v4  ;;  %v103_v4 = vld [vmem:[#allocation2 + $0x88] sm:$0xff] }
  0xb7   :  { %4732 = vmatpush1.bf16.xpose.msra.mxu1 %v10039_v54  ;;  %2082 = vmatpush1.xpose.msra.mxu0 %v643_v41  ;;  %v745_v41 = vcombine.high %v647_v28, %v647_v28 }
  0xb8   :  { %2145 = vmatprep.mubr.f32.mxu0 %v9799_v0  ;;  %4763 = vmatprep.mubr.bf16.mxu1 %v307_v55  ;;  %v10091_v55 = vld [vmem:[#allocation5 + $0xc0] sm:$0x77]  ;;  %v10099_v1 = vpack.c.bf16 %v445_v51, %v445_v51 }
  0xb9   :  { %2151 = vmatprep.subr.mxu0 %v742_v56  ;;  %4771 = vmatprep.subr.bf16.mxu1 %v10041_v58  ;;  %v310_v56 = vpack.c.bf16 %v100_v27, %v100_v27  ;;  %v312_v27 = vpack.c.bf16 %v101_v53, %v101_v53 }
  0xba   :  { %11154 = vst [vmem:[#allocation19_spill] sm:$0xff] %v10099_v1 }
  0xbe   :  { %2146 = vmatmul.mubr.f32.vlgmr.msra.gmra.mrb[0].mxu0 %v9799_v0 }
  0xbf   :  { %2152 = vmatpush1.xpose.msra.mxu0 %v644_v47  ;;  %2215 = vmatprep.mubr.f32.mxu0 %v9799_v0  ;;  %v199_v47 = vcombine.high %v101_v53, %v101_v53 }
  0xc0   :  { %2221 = vmatprep.subr.mxu0 %v743_v3  ;;  %v649_v3 = vmul.f32 %v10091_v55, %v10091_v55 }
  0xc1   :  { %v313_v32 = vpack.c.bf16 %v199_v47, %v199_v47  ;;  %v447_v47 = vcombine.high %v10015_v31, %v10015_v31 }
  0xc2   :  { %4764 = vmatmul.mubr.bf16.vlgmr.msra.gmra.mrb[0].mxu1 %v306_v10  ;;  %v747_v5 = vcombine.high %v649_v3, %v649_v3  ;;  %v102_v10 = vld [vmem:[#allocation2 + $0x80] sm:$0xff] }
  0xc3   :  { %4772 = vmatpush1.bf16.xpose.msra.mxu1 %v10058_v11  ;;  %4803 = vmatprep.mubr.bf16.mxu1 %v309_v13  ;;  %v200_v13 = vcombine.high %v102_v10, %v102_v10  ;;  %v314_v51 = vpack.c.bf16 %v102_v10, %v102_v10  ;;  %v10395_v11 = vld [vmem:[#allocation5 + $0x180] sm:$0x77] }
  0xc4   :  { %4811 = vmatprep.subr.bf16.mxu1 %v10061_v15 }
  0xc6   :  { %2216 = vmatmul.mubr.f32.vlgmr.msra.gmra.mrb[0].mxu0 %v9799_v0 }
  0xc7   :  { %2222 = vmatpush1.xpose.msra.mxu0 %v645_v62  ;;  %2285 = vmatprep.mubr.f32.mxu0 %v9799_v0  ;;  %v10096_v62 = vpack.c.bf16 %v9977_v61, %v9977_v61  ;;  %v10106_v61 = vld [vmem:[#allocation5 + $0xc8] sm:$0x77] }
  0xc8   :  { %2291 = vmatprep.subr.mxu0 %v744_v19  ;;  %v446_v19 = vcombine.high %v10005_v22, %v10005_v22 }
  0xc9   :  { %11153 = vst [vmem:[#allocation18_spill] sm:$0xff] %v10096_v62 }
  0xce   :  { %2286 = vmatmul.mubr.f32.vlgmr.msra.gmra.mrb[0].mxu0 %v9799_v0  ;;  %4804 = vmatmul.mubr.bf16.vlgmr.msra.gmra.mrb[0].mxu1 %v308_v30  ;;  %v10117_v30 = vpack.c.bf16 %v446_v19, %v446_v19 }
  0xcf   :  { %4812 = vmatpush1.bf16.xpose.msra.mxu1 %v10077_v33  ;;  %2292 = vmatpush1.xpose.msra.mxu0 %v646_v18  ;;  %v650_v18 = vmul.f32 %v10106_v61, %v10106_v61 }
  0xd0   :  { %2355 = vmatprep.mubr.f32.mxu0 %v9799_v0  ;;  %4843 = vmatprep.mubr.bf16.mxu1 %v311_v39  ;;  %11156 = vst [vmem:[#allocation21_spill] sm:$0xff] %v10117_v30  ;;  %v10119_v39 = vld [vmem:[#allocation5 + $0xd0] sm:$0x77] }
  0xd1   :  { %2361 = vmatprep.subr.mxu0 %v745_v41  ;;  %4851 = vmatprep.subr.bf16.mxu1 %v10079_v43  ;;  %v748_v29 = vcombine.high %v650_v18, %v650_v18  ;;  %v651_v41 = vmul.f32 %v10119_v39, %v10119_v39  ;;  %v10357_v43 = vld [vmem:[#allocation5 + $0x168] sm:$0x77] }
  0xd3   :  { %v749_v53 = vcombine.high %v651_v41, %v651_v41 }
  0xd6   :  { %2356 = vmatmul.mubr.f32.vlgmr.msra.gmra.mrb[0].mxu0 %v9799_v0 }
  0xd7   :  { %2362 = vmatpush1.xpose.msra.mxu0 %v647_v28  ;;  %2425 = vmatprep.mubr.f32.mxu0 %v9799_v0  ;;  %v315_v28 = vpack.c.bf16 %v200_v13, %v200_v13  ;;  %v104_v13 = vld [vmem:[#allocation2 + $0x90] sm:$0xff] }
  0xd8   :  { %2431 = vmatprep.subr.mxu0 %v746_v50  ;;  %v10129_v50 = vld [vmem:[#allocation5 + $0xd8] sm:$0x77] }
  0xda   :  { %4844 = vmatmul.mubr.bf16.vlgmr.msra.gmra.mrb[0].mxu1 %v310_v56  ;;  %v10134_v56 = vpack.c.bf16 %v10005_v22, %v10005_v22  ;;  %v10144_v22 = vld [vmem:[#allocation5 + $0xe0] sm:$0x77] }
  0xdb   :  { %4852 = vmatpush1.bf16.xpose.msra.mxu1 %v10096_v62  ;;  %4883 = vmatprep.mubr.bf16.mxu1 %v313_v32  ;;  %v653_v19 = vmul.f32 %v10144_v22, %v10144_v22 }
  0xdc   :  { %4891 = vmatprep.subr.bf16.mxu1 %v10099_v1  ;;  %11157 = vst [vmem:[#allocation22_spill] sm:$0xff] %v10134_v56 }
  0xde   :  { %2426 = vmatmul.mubr.f32.vlgmr.msra.gmra.mrb[0].mxu0 %v9799_v0 }
  0xdf   :  { %2432 = vmatpush1.xpose.msra.mxu0 %v648_v45  ;;  %2495 = vmatprep.mubr.f32.mxu0 %v9799_v0  ;;  %v201_v45 = vcombine.high %v103_v4, %v103_v4 }
  0xe0   :  { %2501 = vmatprep.subr.mxu0 %v747_v5  ;;  %v652_v5 = vmul.f32 %v10129_v50, %v10129_v50 }
  0xe1   :  { %v317_v32 = vpack.c.bf16 %v201_v45, %v201_v45 }
  0xe2   :  { %v750_v10 = vcombine.high %v652_v5, %v652_v5 }
  0xe6   :  { %2496 = vmatmul.mubr.f32.vlgmr.msra.gmra.mrb[0].mxu0 %v9799_v0  ;;  %4884 = vmatmul.mubr.bf16.vlgmr.msra.gmra.mrb[0].mxu1 %v312_v27  ;;  %v448_v27 = vcombine.high %v10030_v26, %v10030_v26 }
  0xe7   :  { %4892 = vmatpush1.bf16.xpose.msra.mxu1 %v10115_v14  ;;  %2502 = vmatpush1.xpose.msra.mxu0 %v649_v3  ;;  %v10137_v3 = vpack.c.bf16 %v447_v47, %v447_v47  ;;  %v10319_v14 = vld [vmem:[#allocation5 + $0x150] sm:$0x77] }
  0xe8   :  { %2565 = vmatprep.mubr.f32.mxu0 %v9799_v0  ;;  %4923 = vmatprep.mubr.bf16.mxu1 %v315_v28  ;;  %v316_v28 = vpack.c.bf16 %v103_v4, %v103_v4  ;;  %v10155_v47 = vpack.c.bf16 %v448_v27, %v448_v27  ;;  %v10172_v27 = vpack.c.bf16 %v10030_v26, %v10030_v26  ;;  %v10182_v26 = vld [vmem:[#allocation5 + $0xf8] sm:$0x77] }
  0xe9   :  { %2571 = vmatprep.subr.mxu0 %v748_v29  ;;  %4931 = vmatprep.subr.bf16.mxu1 %v10117_v30  ;;  %11158 = vst [vmem:[#allocation23_spill] sm:$0xff] %v10137_v3  ;;  %v10153_v29 = vpack.c.bf16 %v10015_v31, %v10015_v31  ;;  %v105_v31 = vld [vmem:[#allocation2 + $0x98] sm:$0xff] }
  0xea   :  { %11160 = vst [vmem:[#allocation25_spill] sm:$0xff] %v10155_v47  ;;  %11161 = vst [vmem:[#allocation26_spill] sm:$0xff] %v10172_v27 }
  0xeb   :  { %11159 = vst [vmem:[#allocation24_spill] sm:$0xff] %v10153_v29 }
  0xee   :  { %2566 = vmatmul.mubr.f32.vlgmr.msra.gmra.mrb[0].mxu0 %v9799_v0 }
  0xef   :  { %2572 = vmatpush1.xpose.msra.mxu0 %v650_v18  ;;  %2635 = vmatprep.mubr.f32.mxu0 %v9799_v0  ;;  %v202_v18 = vcombine.high %v104_v13, %v104_v13 }
  0xf0   :  { %2641 = vmatprep.subr.mxu0 %v749_v53  ;;  %v751_v53 = vcombine.high %v653_v19, %v653_v19 }
  0xf1   :  { %v319_v45 = vpack.c.bf16 %v202_v18, %v202_v18  ;;  %v10167_v18 = vld [vmem:[#allocation5 + $0xf0] sm:$0x77] }
  0xf2   :  { %4924 = vmatmul.mubr.bf16.vlgmr.msra.gmra.mrb[0].mxu1 %v314_v51  ;;  %v203_v51 = vcombine.high %v105_v31, %v105_v31 }
  0xf3   :  { %4932 = vmatpush1.bf16.xpose.msra.mxu1 %v10134_v56  ;;  %4963 = vmatprep.mubr.bf16.mxu1 %v317_v32  ;;  %v10281_v56 = vld [vmem:[#allocation5 + $0x138] sm:$0x77] }
  0xf4   :  { %4971 = vmatprep.subr.bf16.mxu1 %v10137_v3  ;;  %v10243_v3 = vld [vmem:[#allocation5 + $0x120] sm:$0x77] }
  0xf6   :  { %2636 = vmatmul.mubr.f32.vlgmr.msra.gmra.mrb[0].mxu0 %v9799_v0 }
  0xf7   :  { %2642 = vmatpush1.xpose.msra.mxu0 %v651_v41  ;;  %2705 = vmatprep.mubr.f32.mxu0 %v9799_v0  ;;  %v10157_v41 = vld [vmem:[#allocation5 + $0xe8] sm:$0x77] }
  0xf8   :  { %2711 = vmatprep.subr.mxu0 %v750_v10  ;;  %v654_v4 = vmul.f32 %v10157_v41, %v10157_v41  ;;  %v449_v10 = vcombine.high %v10043_v59, %v10043_v59 }
  0xfa   :  { %v752_v32 = vcombine.high %v654_v4, %v654_v4 }
  0xfe   :  { %2706 = vmatmul.mubr.f32.vlgmr.msra.gmra.mrb[0].mxu0 %v9799_v0  ;;  %4964 = vmatmul.mubr.bf16.vlgmr.msra.gmra.mrb[0].mxu1 %v316_v28  ;;  %v321_v28 = vpack.c.bf16 %v203_v51, %v203_v51 }
  0xff   :  { %4972 = vmatpush1.bf16.xpose.msra.mxu1 %v10153_v29  ;;  %2712 = vmatpush1.xpose.msra.mxu0 %v652_v5  ;;  %v318_v5 = vpack.c.bf16 %v104_v13, %v104_v13  ;;  %v10205_v29 = vld [vmem:[#allocation5 + $0x108] sm:$0x77] }
 0x100   :  { %2775 = vmatprep.mubr.f32.mxu0 %v9799_v0  ;;  %5003 = vmatprep.mubr.bf16.mxu1 %v319_v45  ;;  %v10175_v45 = vpack.c.bf16 %v449_v10, %v449_v10  ;;  %v450_v10 = vcombine.high %v10053_v7, %v10053_v7 }
 0x101   :  { %2781 = vmatprep.subr.mxu0 %v751_v53  ;;  %5011 = vmatprep.subr.bf16.mxu1 %v10155_v47  ;;  %v655_v53 = vmul.f32 %v10167_v18, %v10167_v18 }
 0x102   :  { %11162 = vst [vmem:[#allocation27_spill] sm:$0xff] %v10175_v45  ;;  %v10193_v47 = vpack.c.bf16 %v450_v10, %v450_v10  ;;  %v451_v10 = vcombine.high %v10068_v42, %v10068_v42 }
 0x103   :  { %v753_v13 = vcombine.high %v655_v53, %v655_v53 }
 0x104   :  { %11164 = vst [vmem:[#allocation29_spill] sm:$0xff] %v10193_v47 }
 0x106   :  { %2776 = vmatmul.mubr.f32.vlgmr.msra.gmra.mrb[0].mxu0 %v9799_v0 }
 0x107   :  { %2782 = vmatpush1.xpose.msra.mxu0 %v653_v19  ;;  %2845 = vmatprep.mubr.f32.mxu0 %v9799_v0  ;;  %v106_v19 = vld [vmem:[#allocation2 + $0xa0] sm:$0xff] }
 0x108   :  { %2851 = vmatprep.subr.mxu0 %v752_v32  ;;  %v204_v51 = vcombine.high %v106_v19, %v106_v19  ;;  %v656_v32 = vmul.f32 %v10182_v26, %v10182_v26 }
 0x10a   :  { %5004 = vmatmul.mubr.bf16.vlgmr.msra.gmra.mrb[0].mxu1 %v318_v5  ;;  %v320_v5 = vpack.c.bf16 %v105_v31, %v105_v31 }
 0x10b   :  { %5012 = vmatpush1.bf16.xpose.msra.mxu1 %v10172_v27  ;;  %5043 = vmatprep.mubr.bf16.mxu1 %v321_v28  ;;  %v10191_v28 = vpack.c.bf16 %v10043_v59, %v10043_v59  ;;  %v754_v27 = vcombine.high %v656_v32, %v656_v32  ;;  %v107_v59 = vld [vmem:[#allocation2 + $0xa8] sm:$0xff] }
 0x10c   :  { %5051 = vmatprep.subr.bf16.mxu1 %v10175_v45  ;;  %v323_v45 = vpack.c.bf16 %v204_v51, %v204_v51 }
 0x10d   :  { %11163 = vst [vmem:[#allocation28_spill] sm:$0xff] %v10191_v28 }
 0x10e   :  { %2846 = vmatmul.mubr.f32.vlgmr.msra.gmra.mrb[0].mxu0 %v9799_v0 }
 0x10f   :  { %2852 = vmatpush1.xpose.msra.mxu0 %v654_v4  ;;  %2915 = vmatprep.mubr.f32.mxu0 %v9799_v0  ;;  %v10195_v4 = vld [vmem:[#allocation5 + $0x100] sm:$0x77] }
 0x110   :  { %2921 = vmatprep.subr.mxu0 %v753_v13  ;;  %v657_v31 = vmul.f32 %v10195_v4, %v10195_v4  ;;  %v205_v13 = vcombine.high %v107_v59, %v107_v59 }
 0x112   :  { %v755_v51 = vcombine.high %v657_v31, %v657_v31 }
 0x116   :  { %2916 = vmatmul.mubr.f32.vlgmr.msra.gmra.mrb[0].mxu0 %v9799_v0  ;;  %5044 = vmatmul.mubr.bf16.vlgmr.msra.gmra.mrb[0].mxu1 %v320_v5  ;;  %v10213_v5 = vpack.c.bf16 %v451_v10, %v451_v10  ;;  %v452_v10 = vcombine.high %v10081_v44, %v10081_v44 }
 0x117   :  { %5052 = vmatpush1.bf16.xpose.msra.mxu1 %v10191_v28  ;;  %2922 = vmatpush1.xpose.msra.mxu0 %v655_v53  ;;  %v322_v53 = vpack.c.bf16 %v106_v19, %v106_v19 }
 0x118   :  { %2985 = vmatprep.mubr.f32.mxu0 %v9799_v0  ;;  %5083 = vmatprep.mubr.bf16.mxu1 %v323_v45  ;;  %v10210_v45 = vpack.c.bf16 %v10053_v7, %v10053_v7  ;;  %11166 = vst [vmem:[#allocation31_spill] sm:$0xff] %v10213_v5  ;;  %v10220_v7 = vld [vmem:[#allocation5 + $0x110] sm:$0x77]  ;;  %v10231_v28 = vpack.c.bf16 %v452_v10, %v452_v10 }
 0x119   :  { %2991 = vmatprep.subr.mxu0 %v754_v27  ;;  %5091 = vmatprep.subr.bf16.mxu1 %v10193_v47  ;;  %v325_v27 = vpack.c.bf16 %v205_v13, %v205_v13  ;;  %v658_v47 = vmul.f32 %v10205_v29, %v10205_v29  ;;  %v453_v10 = vcombine.high %v10091_v55, %v10091_v55 }
 0x11a   :  { %11165 = vst [vmem:[#allocation30_spill] sm:$0xff] %v10210_v45  ;;  %11168 = vst [vmem:[#allocation33_spill] sm:$0xff] %v10231_v28 }
 0x11b   :  { %v756_v19 = vcombine.high %v658_v47, %v658_v47 }
 0x11e   :  { %2986 = vmatmul.mubr.f32.vlgmr.msra.gmra.mrb[0].mxu0 %v9799_v0 }
 0x11f   :  { %2992 = vmatpush1.xpose.msra.mxu0 %v656_v32  ;;  %3055 = vmatprep.mubr.f32.mxu0 %v9799_v0  ;;  %v108_v32 = vld [vmem:[#allocation2 + $0xb0] sm:$0xff] }
 0x120   :  { %3061 = vmatprep.subr.mxu0 %v755_v51  ;;  %v206_v13 = vcombine.high %v108_v32, %v108_v32  ;;  %v659_v51 = vmul.f32 %v10220_v7, %v10220_v7 }
 0x122   :  { %5084 = vmatmul.mubr.bf16.vlgmr.msra.gmra.mrb[0].mxu1 %v322_v53  ;;  %v324_v53 = vpack.c.bf16 %v107_v59, %v107_v59 }
 0x123   :  { %5092 = vmatpush1.bf16.xpose.msra.mxu1 %v10210_v45  ;;  %5123 = vmatprep.mubr.bf16.mxu1 %v325_v27  ;;  %v10229_v27 = vpack.c.bf16 %v10068_v42, %v10068_v42  ;;  %v757_v45 = vcombine.high %v659_v51, %v659_v51  ;;  %v109_v42 = vld [vmem:[#allocation2 + $0xb8] sm:$0xff] }
 0x124   :  { %5131 = vmatprep.subr.bf16.mxu1 %v10213_v5  ;;  %v327_v5 = vpack.c.bf16 %v206_v13, %v206_v13 }
 0x125   :  { %11167 = vst [vmem:[#allocation32_spill] sm:$0xff] %v10229_v27 }
 0x126   :  { %3056 = vmatmul.mubr.f32.vlgmr.msra.gmra.mrb[0].mxu0 %v9799_v0 }
 0x127   :  { %3062 = vmatpush1.xpose.msra.mxu0 %v657_v31  ;;  %3125 = vmatprep.mubr.f32.mxu0 %v9799_v0  ;;  %v10233_v31 = vld [vmem:[#allocation5 + $0x118] sm:$0x77] }
 0x128   :  { %3131 = vmatprep.subr.mxu0 %v756_v19  ;;  %v660_v59 = vmul.f32 %v10233_v31, %v10233_v31  ;;  %v207_v19 = vcombine.high %v109_v42, %v109_v42 }
 0x12a   :  { %v758_v13 = vcombine.high %v660_v59, %v660_v59 }
 0x12e   :  { %3126 = vmatmul.mubr.f32.vlgmr.msra.gmra.mrb[0].mxu0 %v9799_v0  ;;  %5124 = vmatmul.mubr.bf16.vlgmr.msra.gmra.mrb[0].mxu1 %v324_v53  ;;  %v10251_v53 = vpack.c.bf16 %v453_v10, %v453_v10  ;;  %v454_v10 = vcombine.high %v10106_v61, %v10106_v61 }
 0x12f   :  { %5132 = vmatpush1.bf16.xpose.msra.mxu1 %v10229_v27  ;;  %3132 = vmatpush1.xpose.msra.mxu0 %v658_v47  ;;  %v326_v47 = vpack.c.bf16 %v108_v32, %v108_v32 }
 0x130   :  { %3195 = vmatprep.mubr.f32.mxu0 %v9799_v0  ;;  %5163 = vmatprep.mubr.bf16.mxu1 %v327_v5  ;;  %v10248_v5 = vpack.c.bf16 %v10081_v44, %v10081_v44  ;;  %11170 = vst [vmem:[#allocation35_spill] sm:$0xff] %v10251_v53  ;;  %v10258_v44 = vld [vmem:[#allocation5 + $0x128] sm:$0x77]  ;;  %v10269_v27 = vpack.c.bf16 %v454_v10, %v454_v10 }
 0x131   :  { %3201 = vmatprep.subr.mxu0 %v757_v45  ;;  %5171 = vmatprep.subr.bf16.mxu1 %v10231_v28  ;;  %v329_v45 = vpack.c.bf16 %v207_v19, %v207_v19  ;;  %v661_v28 = vmul.f32 %v10243_v3, %v10243_v3  ;;  %v455_v10 = vcombine.high %v10119_v39, %v10119_v39 }
 0x132   :  { %11169 = vst [vmem:[#allocation34_spill] sm:$0xff] %v10248_v5  ;;  %11172 = vst [vmem:[#allocation37_spill] sm:$0xff] %v10269_v27 }
 0x133   :  { %v759_v32 = vcombine.high %v661_v28, %v661_v28 }
 0x136   :  { %3196 = vmatmul.mubr.f32.vlgmr.msra.gmra.mrb[0].mxu0 %v9799_v0 }
 0x137   :  { %3202 = vmatpush1.xpose.msra.mxu0 %v659_v51  ;;  %3265 = vmatprep.mubr.f32.mxu0 %v9799_v0  ;;  %v110_v51 = vld [vmem:[#allocation2 + $0xc0] sm:$0xff] }
 0x138   :  { %3271 = vmatprep.subr.mxu0 %v758_v13  ;;  %v208_v19 = vcombine.high %v110_v51, %v110_v51  ;;  %v662_v13 = vmul.f32 %v10258_v44, %v10258_v44 }
 0x13a   :  { %5164 = vmatmul.mubr.bf16.vlgmr.msra.gmra.mrb[0].mxu1 %v326_v47  ;;  %v328_v47 = vpack.c.bf16 %v109_v42, %v109_v42 }
 0x13b   :  { %5172 = vmatpush1.bf16.xpose.msra.mxu1 %v10248_v5  ;;  %5203 = vmatprep.mubr.bf16.mxu1 %v329_v45  ;;  %v10267_v45 = vpack.c.bf16 %v10091_v55, %v10091_v55  ;;  %v760_v5 = vcombine.high %v662_v13, %v662_v13  ;;  %v111_v55 = vld [vmem:[#allocation2 + $0xc8] sm:$0xff] }
 0x13c   :  { %5211 = vmatprep.subr.bf16.mxu1 %v10251_v53  ;;  %v331_v53 = vpack.c.bf16 %v208_v19, %v208_v19 }
 0x13d   :  { %11171 = vst [vmem:[#allocation36_spill] sm:$0xff] %v10267_v45 }
 0x13e   :  { %3266 = vmatmul.mubr.f32.vlgmr.msra.gmra.mrb[0].mxu0 %v9799_v0 }
 0x13f   :  { %3272 = vmatpush1.xpose.msra.mxu0 %v660_v59  ;;  %3335 = vmatprep.mubr.f32.mxu0 %v9799_v0  ;;  %v10271_v59 = vld [vmem:[#allocation5 + $0x130] sm:$0x77] }
 0x140   :  { %3341 = vmatprep.subr.mxu0 %v759_v32  ;;  %v663_v42 = vmul.f32 %v10271_v59, %v10271_v59  ;;  %v209_v32 = vcombine.high %v111_v55, %v111_v55 }
 0x142   :  { %v761_v19 = vcombine.high %v663_v42, %v663_v42 }
 0x146   :  { %3336 = vmatmul.mubr.f32.vlgmr.msra.gmra.mrb[0].mxu0 %v9799_v0  ;;  %5204 = vmatmul.mubr.bf16.vlgmr.msra.gmra.mrb[0].mxu1 %v328_v47  ;;  %v10289_v47 = vpack.c.bf16 %v455_v10, %v455_v10  ;;  %v456_v10 = vcombine.high %v10129_v50, %v10129_v50 }
 0x147   :  { %5212 = vmatpush1.bf16.xpose.msra.mxu1 %v10267_v45  ;;  %3342 = vmatpush1.xpose.msra.mxu0 %v661_v28  ;;  %v330_v28 = vpack.c.bf16 %v110_v51, %v110_v51 }
 0x148   :  { %3405 = vmatprep.mubr.f32.mxu0 %v9799_v0  ;;  %5243 = vmatprep.mubr.bf16.mxu1 %v331_v53  ;;  %v10286_v53 = vpack.c.bf16 %v10106_v61, %v10106_v61  ;;  %v10296_v61 = vld [vmem:[#allocation5 + $0x140] sm:$0x77]  ;;  %v10307_v30 = vpack.c.bf16 %v456_v10, %v456_v10  ;;  %v457_v10 = vcombine.high %v10144_v22, %v10144_v22 }
 0x149   :  { %3411 = vmatprep.subr.mxu0 %v760_v5  ;;  %5251 = vmatprep.subr.bf16.mxu1 %v10269_v27  ;;  %v333_v5 = vpack.c.bf16 %v209_v32, %v209_v32  ;;  %v664_v27 = vmul.f32 %v10281_v56, %v10281_v56 }
 0x14a   :  { %11173 = vst [vmem:[#allocation38_spill] sm:$0xff] %v10286_v53  ;;  %11174 = vst [vmem:[#allocation39_spill] sm:$0xff] %v10307_v30 }
 0x14b   :  { %v762_v51 = vcombine.high %v664_v27, %v664_v27 }
 0x14e   :  { %3406 = vmatmul.mubr.f32.vlgmr.msra.gmra.mrb[0].mxu0 %v9799_v0 }
 0x14f   :  { %3412 = vmatpush1.xpose.msra.mxu0 %v662_v13  ;;  %3475 = vmatprep.mubr.f32.mxu0 %v9799_v0  ;;  %v112_v13 = vld [vmem:[#allocation2 + $0xd0] sm:$0xff] }
 0x150   :  { %3481 = vmatprep.subr.mxu0 %v761_v19  ;;  %v210_v32 = vcombine.high %v112_v13, %v112_v13  ;;  %v665_v19 = vmul.f32 %v10296_v61, %v10296_v61 }
 0x152   :  { %5244 = vmatmul.mubr.bf16.vlgmr.msra.gmra.mrb[0].mxu1 %v330_v28  ;;  %v332_v28 = vpack.c.bf16 %v111_v55, %v111_v55  ;;  %v763_v45 = vcombine.high %v665_v19, %v665_v19 }
 0x153   :  { %5252 = vmatpush1.bf16.xpose.msra.mxu1 %v10286_v53  ;;  %5283 = vmatprep.mubr.bf16.mxu1 %v333_v5  ;;  %v10305_v5 = vpack.c.bf16 %v10119_v39, %v10119_v39  ;;  %v335_v53 = vpack.c.bf16 %v210_v32, %v210_v32  ;;  %v113_v39 = vld [vmem:[#allocation2 + $0xd8] sm:$0xff] }
 0x154   :  { %5291 = vmatprep.subr.bf16.mxu1 %v10289_v47 }
 0x156   :  { %3476 = vmatmul.mubr.f32.vlgmr.msra.gmra.mrb[0].mxu0 %v9799_v0 }
 0x157   :  { %3482 = vmatpush1.xpose.msra.mxu0 %v663_v42  ;;  %3545 = vmatprep.mubr.f32.mxu0 %v9799_v0  ;;  %v10309_v42 = vld [vmem:[#allocation5 + $0x148] sm:$0x77] }
 0x158   :  { %3551 = vmatprep.subr.mxu0 %v762_v51  ;;  %v666_v55 = vmul.f32 %v10309_v42, %v10309_v42  ;;  %v211_v51 = vcombine.high %v113_v39, %v113_v39 }
 0x15a   :  { %v764_v32 = vcombine.high %v666_v55, %v666_v55 }
 0x15e   :  { %3546 = vmatmul.mubr.f32.vlgmr.msra.gmra.mrb[0].mxu0 %v9799_v0  ;;  %5284 = vmatmul.mubr.bf16.vlgmr.msra.gmra.mrb[0].mxu1 %v332_v28  ;;  %v10327_v28 = vpack.c.bf16 %v457_v10, %v457_v10  ;;  %v458_v10 = vcombine.high %v10157_v41, %v10157_v41 }
 0x15f   :  { %5292 = vmatpush1.bf16.xpose.msra.mxu1 %v10305_v5  ;;  %3552 = vmatpush1.xpose.msra.mxu0 %v664_v27  ;;  %v334_v27 = vpack.c.bf16 %v112_v13, %v112_v13 }
 0x160   :  { %3615 = vmatprep.mubr.f32.mxu0 %v9799_v0  ;;  %5323 = vmatprep.mubr.bf16.mxu1 %v335_v53  ;;  %v10324_v53 = vpack.c.bf16 %v10129_v50, %v10129_v50  ;;  %v10334_v50 = vld [vmem:[#allocation5 + $0x158] sm:$0x77]  ;;  %v10345_v62 = vpack.c.bf16 %v458_v10, %v458_v10  ;;  %v459_v10 = vcombine.high %v10167_v18, %v10167_v18 }
 0x161   :  { %3621 = vmatprep.subr.mxu0 %v763_v45  ;;  %5331 = vmatprep.subr.bf16.mxu1 %v10307_v30  ;;  %v337_v45 = vpack.c.bf16 %v211_v51, %v211_v51  ;;  %v667_v30 = vmul.f32 %v10319_v14, %v10319_v14 }
 0x162   :  { %11175 = vst [vmem:[#allocation40_spill] sm:$0xff] %v10324_v53  ;;  %11176 = vst [vmem:[#allocation41_spill] sm:$0xff] %v10345_v62 }
 0x163   :  { %v765_v13 = vcombine.high %v667_v30, %v667_v30 }
 0x166   :  { %3616 = vmatmul.mubr.f32.vlgmr.msra.gmra.mrb[0].mxu0 %v9799_v0 }
 0x167   :  { %3622 = vmatpush1.xpose.msra.mxu0 %v665_v19  ;;  %3685 = vmatprep.mubr.f32.mxu0 %v9799_v0  ;;  %v114_v19 = vld [vmem:[#allocation2 + $0xe0] sm:$0xff] }
 0x168   :  { %3691 = vmatprep.subr.mxu0 %v764_v32  ;;  %v212_v51 = vcombine.high %v114_v19, %v114_v19  ;;  %v668_v32 = vmul.f32 %v10334_v50, %v10334_v50 }
 0x16a   :  { %5324 = vmatmul.mubr.bf16.vlgmr.msra.gmra.mrb[0].mxu1 %v334_v27  ;;  %v336_v27 = vpack.c.bf16 %v113_v39, %v113_v39  ;;  %v766_v1 = vcombine.high %v668_v32, %v668_v32 }
 0x16b   :  { %5332 = vmatpush1.bf16.xpose.msra.mxu1 %v10324_v53  ;;  %5363 = vmatprep.mubr.bf16.mxu1 %v337_v45  ;;  %v10343_v45 = vpack.c.bf16 %v10144_v22, %v10144_v22  ;;  %v339_v53 = vpack.c.bf16 %v212_v51, %v212_v51  ;;  %v115_v22 = vld [vmem:[#allocation2 + $0xe8] sm:$0xff] }
 0x16c   :  { %5371 = vmatprep.subr.bf16.mxu1 %v10327_v28 }
 0x16e   :  { %3686 = vmatmul.mubr.f32.vlgmr.msra.gmra.mrb[0].mxu0 %v9799_v0 }
 0x16f   :  { %3692 = vmatpush1.xpose.msra.mxu0 %v666_v55  ;;  %3755 = vmatprep.mubr.f32.mxu0 %v9799_v0  ;;  %v10347_v55 = vld [vmem:[#allocation5 + $0x160] sm:$0x77] }
 0x170   :  { %3761 = vmatprep.subr.mxu0 %v765_v13  ;;  %v669_v39 = vmul.f32 %v10347_v55, %v10347_v55  ;;  %v213_v13 = vcombine.high %v115_v22, %v115_v22 }
 0x172   :  { %v767_v51 = vcombine.high %v669_v39, %v669_v39 }
 0x176   :  { %3756 = vmatmul.mubr.f32.vlgmr.msra.gmra.mrb[0].mxu0 %v9799_v0  ;;  %5364 = vmatmul.mubr.bf16.vlgmr.msra.gmra.mrb[0].mxu1 %v336_v27  ;;  %v10365_v27 = vpack.c.bf16 %v459_v10, %v459_v10  ;;  %v460_v10 = vcombine.high %v10182_v26, %v10182_v26 }
 0x177   :  { %5372 = vmatpush1.bf16.xpose.msra.mxu1 %v10343_v45  ;;  %3762 = vmatpush1.xpose.msra.mxu0 %v667_v30  ;;  %v338_v30 = vpack.c.bf16 %v114_v19, %v114_v19 }
 0x178   :  { %3825 = vmatprep.mubr.f32.mxu0 %v9799_v0  ;;  %5403 = vmatprep.mubr.bf16.mxu1 %v339_v53  ;;  %v10362_v53 = vpack.c.bf16 %v10157_v41, %v10157_v41  ;;  %v10372_v41 = vld [vmem:[#allocation5 + $0x170] sm:$0x77]  ;;  %v10383_v15 = vpack.c.bf16 %v460_v10, %v460_v10  ;;  %v461_v10 = vcombine.high %v10195_v4, %v10195_v4 }
 0x179   :  { %3831 = vmatprep.subr.mxu0 %v766_v1  ;;  %5411 = vmatprep.subr.bf16.mxu1 %v10345_v62  ;;  %v341_v1 = vpack.c.bf16 %v213_v13, %v213_v13  ;;  %v670_v62 = vmul.f32 %v10357_v43, %v10357_v43 }
 0x17a   :  { %11177 = vst [vmem:[#allocation42_spill] sm:$0xff] %v10362_v53  ;;  %11178 = vst [vmem:[#allocation43_spill] sm:$0xff] %v10383_v15 }
 0x17b   :  { %v768_v19 = vcombine.high %v670_v62, %v670_v62 }
 0x17e   :  { %3826 = vmatmul.mubr.f32.vlgmr.msra.gmra.mrb[0].mxu0 %v9799_v0 }
 0x17f   :  { %3832 = vmatpush1.xpose.msra.mxu0 %v668_v32  ;;  %3895 = vmatprep.mubr.f32.mxu0 %v9799_v0  ;;  %v116_v32 = vld [vmem:[#allocation2 + $0xf0] sm:$0xff] }
 0x180   :  { %3901 = vmatprep.subr.mxu0 %v767_v51  ;;  %v214_v13 = vcombine.high %v116_v32, %v116_v32  ;;  %v671_v51 = vmul.f32 %v10372_v41, %v10372_v41 }
 0x182   :  { %5404 = vmatmul.mubr.bf16.vlgmr.msra.gmra.mrb[0].mxu1 %v338_v30  ;;  %v340_v30 = vpack.c.bf16 %v115_v22, %v115_v22  ;;  %v769_v33 = vcombine.high %v671_v51, %v671_v51 }
 0x183   :  { %5412 = vmatpush1.bf16.xpose.msra.mxu1 %v10362_v53  ;;  %5443 = vmatprep.mubr.bf16.mxu1 %v341_v1  ;;  %v10381_v1 = vpack.c.bf16 %v10167_v18, %v10167_v18  ;;  %v343_v53 = vpack.c.bf16 %v214_v13, %v214_v13  ;;  %v117_v18 = vld [vmem:[#allocation2 + $0xf8] sm:$0xff] }
 0x184   :  { %5451 = vmatprep.subr.bf16.mxu1 %v10365_v27 }
 0x186   :  { %3896 = vmatmul.mubr.f32.vlgmr.msra.gmra.mrb[0].mxu0 %v9799_v0 }
 0x187   :  { %3902 = vmatpush1.xpose.msra.mxu0 %v669_v39  ;;  %3965 = vmatprep.mubr.f32.mxu0 %v9799_v0  ;;  %v10385_v39 = vld [vmem:[#allocation5 + $0x178] sm:$0x77] }
 0x188   :  { %3971 = vmatprep.subr.mxu0 %v768_v19  ;;  %v672_v22 = vmul.f32 %v10385_v39, %v10385_v39  ;;  %v215_v19 = vcombine.high %v117_v18, %v117_v18 }
 0x18a   :  { %v770_v13 = vcombine.high %v672_v22, %v672_v22 }
 0x18e   :  { %3966 = vmatmul.mubr.f32.vlgmr.msra.gmra.mrb[0].mxu0 %v9799_v0  ;;  %5444 = vmatmul.mubr.bf16.vlgmr.msra.gmra.mrb[0].mxu1 %v340_v30  ;;  %v10403_v30 = vpack.c.bf16 %v461_v10, %v461_v10  ;;  %v462_v10 = vcombine.high %v10205_v29, %v10205_v29 }
 0x18f   :  { %5452 = vmatpush1.bf16.xpose.msra.mxu1 %v10381_v1  ;;  %3972 = vmatpush1.xpose.msra.mxu0 %v670_v62  ;;  %v342_v62 = vpack.c.bf16 %v116_v32, %v116_v32 }
 0x190   :  { %4035 = vmatprep.mubr.f32.mxu0 %v9799_v0  ;;  %5483 = vmatprep.mubr.bf16.mxu1 %v343_v53  ;;  %v10400_v53 = vpack.c.bf16 %v10182_v26, %v10182_v26  ;;  %v9800_v26 = vmov 65535  }
 0x191   :  { %4041 = vmatprep.subr.mxu0 %v769_v33  ;;  %5491 = vmatprep.subr.bf16.mxu1 %v10383_v15  ;;  %v345_v33 = vpack.c.bf16 %v215_v19, %v215_v19  ;;  %v673_v15 = vmul.f32 %v10395_v11, %v10395_v11  ;;  %v6246_v19 = vsel %vm6244_vm0, 4294967295, %v9800_v26  ;;  %v10421_v26 = vpack.c.bf16 %v462_v10, %v462_v10 }
 0x192   :  { %11179 = vst [vmem:[#allocation44_spill] sm:$0xff] %v10400_v53 }
 0x193   :  { %v771_v32 = vcombine.high %v673_v15, %v673_v15  ;;  %11180 = vst [vmem:[#allocation45_spill] sm:$0xff] %v10421_v26 }
 0x196   :  { %4036 = vmatmul.mubr.f32.vlgmr.msra.gmra.mrb[0].mxu0 %v9799_v0 }
 0x197   :  { %4042 = vmatpush1.xpose.msra.mxu0 %v671_v51  ;;  %4105 = vmatprep.mubr.f32.mxu0 %v9799_v0  ;;  %v118_v51 = vld [vmem:[#allocation2 + $0x100] sm:$0xff] }
 0x198   :  { %4111 = vmatprep.subr.mxu0 %v770_v13  ;;  %v216_v13 = vcombine.high %v118_v51, %v118_v51 }
 0x19a   :  { %5484 = vmatmul.mubr.bf16.vlgmr.msra.gmra.mrb[0].mxu1 %v342_v62  ;;  %v10413_v62 = vsel %vm6245_vm1, %v6246_v19, 0  ;;  %v347_v58 = vpack.c.bf16 %v216_v13, %v216_v13 }
 0x19b   :  { %5492 = vmatpush1.bf16.xpose.msra.mxu1 %v10400_v53  ;;  %5523 = vmatprep.mubr.bf16.mxu1 %v345_v33  ;;  %v344_v33 = vpack.c.bf16 %v117_v18, %v117_v18  ;;  %v10417_v53 = vpack.c.bf16 %v10195_v4, %v10195_v4  ;;  %v6252_v54 = vand.u32 %v10413_v62, %v9846_v12 }
 0x19c   :  { %5531 = vmatprep.subr.bf16.mxu1 %v10403_v30  ;;  %v6249_v4 = vand.u32 %v10413_v62, %v9844_v8  ;;  %v463_v12 = vcombine.high %v10220_v7, %v10220_v7  ;;  %v120_v8 = vld [vmem:[#allocation2 + $0x110] sm:$0xff] }
 0x19e   :  { %4106 = vmatmul.mubr.f32.vlgmr.msra.gmra.mrb[0].mxu0 %v9799_v0 }
 0x19f   :  { %4112 = vmatpush1.xpose.msra.mxu0 %v672_v22  ;;  %4175 = vmatprep.mubr.f32.mxu0 %v9799_v0  ;;  %v119_v22 = vld [vmem:[#allocation2 + $0x108] sm:$0xff] }
 0x1a0   :  { %4181 = vmatprep.subr.mxu0 %v771_v32  ;;  %v217_v18 = vcombine.high %v119_v22, %v119_v22  ;;  %v346_v32 = vpack.c.bf16 %v118_v51, %v118_v51  ;;  %v348_v51 = vpack.c.bf16 %v119_v22, %v119_v22  ;;  %v10454_v22 = vpack.c.bf16 %v10233_v31, %v10233_v31 }
 0x1a2   :  { %v349_v19 = vpack.c.bf16 %v217_v18, %v217_v18  ;;  %v465_v18 = vcombine.high %v10243_v3, %v10243_v3  ;;  %11183 = vst [vmem:[#allocation48_spill] sm:$0xff] %v10454_v22 }
 0x1a6   :  { %4176 = vmatmul.mubr.f32.vlgmr.msra.gmra.mrb[0].mxu0 %v9799_v0  ;;  %5524 = vmatmul.mubr.bf16.vlgmr.msra.gmra.mrb[0].mxu1 %v344_v33  ;;  %v121_v33 = vld [vmem:[#allocation2 + $0x118] sm:$0xff] }
 0x1a7   :  { %5532 = vmatpush1.bf16.xpose.msra.mxu1 %v10417_v53  ;;  %4182 = vmatpush1.xpose.msra.mxu0 %v673_v15  ;;  %v10434_v15 = vpack.c.bf16 %v10205_v29, %v10205_v29  ;;  %v10444_v29 = vpack.c.bf16 %v10220_v7, %v10220_v7 }
 0x1a8   :  { %4245 = vmatprep.mubr.f32.mxu0 %v9799_v0  ;;  %5563 = vmatprep.mubr.bf16.mxu1 %v347_v58  ;;  %v10436_v58 = vpack.c.bf16 %v463_v12, %v463_v12  ;;  %v350_v12 = vpack.c.bf16 %v120_v8, %v120_v8 }
 0x1a9   :  { %5571 = vmatprep.subr.bf16.mxu1 %v10421_v26  ;;  %6542 = vmatprep.subr.bf16.mxu0 %v6252_v54  ;;  %11181 = vst [vmem:[#allocation46_spill] sm:$0xff] %v10434_v15  ;;  %v218_v54 = vcombine.high %v120_v8, %v120_v8  ;;  %v10464_v8 = vpack.c.bf16 %v10243_v3, %v10243_v3 }
 0x1ab   :  { %v351_v13 = vpack.c.bf16 %v218_v54, %v218_v54 }
 0x1ae   :  { %4246 = vmatmul.mubr.f32.vlgmr.msra.gmra.mrb[0].mxu0 %v9799_v0  ;;  %v464_v0 = vcombine.high %v10233_v31, %v10233_v31 }
 0x1af   :  { %6543 = vmatpush1.bf16.msra.mxu0 %v6249_v4  ;;  %v219_v4 = vcombine.high %v121_v33, %v121_v33 }
 0x1b0   :  { %v10446_v10 = vpack.c.bf16 %v464_v0, %v464_v0  ;;  %v466_v0 = vcombine.high %v10258_v44, %v10258_v44 }
 0x1b1   :  { %v353_v7 = vpack.c.bf16 %v219_v4, %v219_v4  ;;  %v123_v4 = vld [vmem:[#allocation2 + $0x128] sm:$0xff] }
 0x1b2   :  { %5564 = vmatmul.mubr.bf16.vlgmr.msra.gmra.mrb[0].mxu1 %v346_v32  ;;  %11182 = vst [vmem:[#allocation47_spill] sm:$0xff] %v10446_v10  ;;  %v10456_v32 = vpack.c.bf16 %v465_v18, %v465_v18  ;;  %v221_v18 = vcombine.high %v123_v4, %v123_v4 }
 0x1b3   :  { %5572 = vmatpush1.bf16.xpose.msra.mxu1 %v10434_v15  ;;  %5603 = vmatprep.mubr.bf16.mxu1 %v349_v19  ;;  %v122_v19 = vld [vmem:[#allocation2 + $0x120] sm:$0xff] }
 0x1b4   :  { %5611 = vmatprep.subr.bf16.mxu1 %v10436_v58  ;;  %v220_v54 = vcombine.high %v122_v19, %v122_v19  ;;  %v357_v3 = vpack.c.bf16 %v221_v18, %v221_v18 }
 0x1b6   :  { %v355_v31 = vpack.c.bf16 %v220_v54, %v220_v54 }
 0x1be   :  { %5604 = vmatmul.mubr.bf16.vlgmr.msra.gmra.mrb[0].mxu1 %v348_v51  ;;  %v352_v51 = vpack.c.bf16 %v121_v33, %v121_v33  ;;  %v10474_v33 = vpack.c.bf16 %v10258_v44, %v10258_v44 }
 0x1bf   :  { %5612 = vmatpush1.bf16.xpose.msra.mxu1 %v10444_v29  ;;  %5643 = vmatprep.mubr.bf16.mxu1 %v351_v13  ;;  %v10466_v13 = vpack.c.bf16 %v466_v0, %v466_v0  ;;  %v124_v0 = vld [vmem:[#allocation2 + $0x130] sm:$0xff] }
 0x1c0   :  { %5651 = vmatprep.subr.bf16.mxu1 %v10446_v10  ;;  %11185 = vst [vmem:[#allocation50_spill] sm:$0xff] %v10474_v33 }
 0x1c1   :  { %11184 = vst [vmem:[#allocation49_spill] sm:$0xff] %v10466_v13 }
 0x1ca   :  { %5644 = vmatmul.mubr.bf16.vlgmr.msra.gmra.mrb[0].mxu1 %v350_v12  ;;  %v467_v12 = vcombine.high %v10271_v59, %v10271_v59 }
 0x1cb   :  { %5652 = vmatpush1.bf16.xpose.msra.mxu1 %v10454_v22  ;;  %5683 = vmatprep.mubr.bf16.mxu1 %v353_v7  ;;  %v354_v7 = vpack.c.bf16 %v122_v19, %v122_v19  ;;  %v10484_v19 = vpack.c.bf16 %v10271_v59, %v10271_v59 }
 0x1cc   :  { %5691 = vmatprep.subr.bf16.mxu1 %v10456_v32  ;;  %v10476_v54 = vpack.c.bf16 %v467_v12, %v467_v12  ;;  %v125_v12 = vld [vmem:[#allocation2 + $0x138] sm:$0xff] }
 0x1d6   :  { %5684 = vmatmul.mubr.bf16.vlgmr.msra.gmra.mrb[0].mxu1 %v352_v51  ;;  %v222_v51 = vcombine.high %v124_v0, %v124_v0 }
 0x1d7   :  { %5692 = vmatpush1.bf16.xpose.msra.mxu1 %v10464_v8  ;;  %5723 = vmatprep.mubr.bf16.mxu1 %v355_v31  ;;  %v468_v31 = vcombine.high %v10281_v56, %v10281_v56 }
 0x1d8   :  { %5731 = vmatprep.subr.bf16.mxu1 %v10466_v13  ;;  %v356_v13 = vpack.c.bf16 %v123_v4, %v123_v4  ;;  %v359_v44 = vpack.c.bf16 %v222_v51, %v222_v51  ;;  %v10494_v4 = vpack.c.bf16 %v10281_v56, %v10281_v56 }
 0x1d9   :  { %v10486_v18 = vpack.c.bf16 %v468_v31, %v468_v31 }
 0x1da   :  { %11187 = vst [vmem:[#allocation52_spill] sm:$0xff] %v10494_v4 }
 0x1db   :  { %11186 = vst [vmem:[#allocation51_spill] sm:$0xff] %v10486_v18 }
 0x1e2   :  { %5724 = vmatmul.mubr.bf16.vlgmr.msra.gmra.mrb[0].mxu1 %v354_v7  ;;  %v223_v7 = vcombine.high %v125_v12, %v125_v12 }
 0x1e3   :  { %5732 = vmatpush1.bf16.xpose.msra.mxu1 %v10474_v33  ;;  %5763 = vmatprep.mubr.bf16.mxu1 %v357_v3  ;;  %v469_v3 = vcombine.high %v10296_v61, %v10296_v61  ;;  %v358_v33 = vpack.c.bf16 %v124_v0, %v124_v0  ;;  %v10504_v0 = vpack.c.bf16 %v10296_v61, %v10296_v61 }
 0x1e4   :  { %5771 = vmatprep.subr.bf16.mxu1 %v10476_v54  ;;  %v361_v59 = vpack.c.bf16 %v223_v7, %v223_v7 }
 0x1e5   :  { %v10496_v51 = vpack.c.bf16 %v469_v3, %v469_v3 }
 0x1ee   :  { %5764 = vmatmul.mubr.bf16.vlgmr.msra.gmra.mrb[0].mxu1 %v356_v13  ;;  %v126_v13 = vld [vmem:[#allocation2 + $0x140] sm:$0xff] }
 0x1ef   :  { %5772 = vmatpush1.bf16.xpose.msra.mxu1 %v10484_v19  ;;  %5803 = vmatprep.mubr.bf16.mxu1 %v359_v44  ;;  %v224_v31 = vcombine.high %v126_v13, %v126_v13  ;;  %v470_v44 = vcombine.high %v10309_v42, %v10309_v42 }
 0x1f0   :  { %5811 = vmatprep.subr.bf16.mxu1 %v10486_v18  ;;  %v360_v18 = vpack.c.bf16 %v125_v12, %v125_v12  ;;  %v10514_v12 = vpack.c.bf16 %v10309_v42, %v10309_v42 }
 0x1f1   :  { %v363_v56 = vpack.c.bf16 %v224_v31, %v224_v31  ;;  %v10506_v7 = vpack.c.bf16 %v470_v44, %v470_v44 }
 0x1f2   :  { %11189 = vst [vmem:[#allocation54_spill] sm:$0xff] %v10514_v12 }
 0x1f3   :  { %11188 = vst [vmem:[#allocation53_spill] sm:$0xff] %v10506_v7 }
 0x1fa   :  { %5804 = vmatmul.mubr.bf16.vlgmr.msra.gmra.mrb[0].mxu1 %v358_v33  ;;  %v127_v33 = vld [vmem:[#allocation2 + $0x148] sm:$0xff] }
 0x1fb   :  { %5812 = vmatpush1.bf16.xpose.msra.mxu1 %v10494_v4  ;;  %5843 = vmatprep.mubr.bf16.mxu1 %v361_v59  ;;  %v225_v3 = vcombine.high %v127_v33, %v127_v33  ;;  %v471_v59 = vcombine.high %v10319_v14, %v10319_v14  ;;  %v362_v4 = vpack.c.bf16 %v126_v13, %v126_v13 }
 0x1fc   :  { %5851 = vmatprep.subr.bf16.mxu1 %v10496_v51  ;;  %v10524_v13 = vpack.c.bf16 %v10319_v14, %v10319_v14 }
 0x1fd   :  { %v365_v61 = vpack.c.bf16 %v225_v3, %v225_v3  ;;  %v10516_v31 = vpack.c.bf16 %v471_v59, %v471_v59 }
 0x206   :  { %5844 = vmatmul.mubr.bf16.vlgmr.msra.gmra.mrb[0].mxu1 %v360_v18  ;;  %v128_v18 = vld [vmem:[#allocation2 + $0x150] sm:$0xff] }
 0x207   :  { %5852 = vmatpush1.bf16.xpose.msra.mxu1 %v10504_v0  ;;  %5883 = vmatprep.mubr.bf16.mxu1 %v363_v56  ;;  %v226_v44 = vcombine.high %v128_v18, %v128_v18  ;;  %v472_v56 = vcombine.high %v10334_v50, %v10334_v50 }
 0x208   :  { %5891 = vmatprep.subr.bf16.mxu1 %v10506_v7  ;;  %v364_v7 = vpack.c.bf16 %v127_v33, %v127_v33  ;;  %v10534_v33 = vpack.c.bf16 %v10334_v50, %v10334_v50 }
 0x209   :  { %v367_v42 = vpack.c.bf16 %v226_v44, %v226_v44  ;;  %v10526_v3 = vpack.c.bf16 %v472_v56, %v472_v56 }
 0x20a   :  { %11191 = vst [vmem:[#allocation56_spill] sm:$0xff] %v10534_v33 }
 0x20b   :  { %11190 = vst [vmem:[#allocation55_spill] sm:$0xff] %v10526_v3 }
 0x212   :  { %5884 = vmatmul.mubr.bf16.vlgmr.msra.gmra.mrb[0].mxu1 %v362_v4  ;;  %v129_v4 = vld [vmem:[#allocation2 + $0x158] sm:$0xff] }
 0x213   :  { %5892 = vmatpush1.bf16.xpose.msra.mxu1 %v10514_v12  ;;  %5923 = vmatprep.mubr.bf16.mxu1 %v365_v61  ;;  %v227_v59 = vcombine.high %v129_v4, %v129_v4  ;;  %v473_v61 = vcombine.high %v10347_v55, %v10347_v55  ;;  %v366_v12 = vpack.c.bf16 %v128_v18, %v128_v18 }
 0x214   :  { %5931 = vmatprep.subr.bf16.mxu1 %v10516_v31  ;;  %v10544_v18 = vpack.c.bf16 %v10347_v55, %v10347_v55 }
 0x215   :  { %v369_v14 = vpack.c.bf16 %v227_v59, %v227_v59  ;;  %v10536_v44 = vpack.c.bf16 %v473_v61, %v473_v61 }
 0x21e   :  { %5924 = vmatmul.mubr.bf16.vlgmr.msra.gmra.mrb[0].mxu1 %v364_v7  ;;  %v130_v7 = vld [vmem:[#allocation2 + $0x160] sm:$0xff] }
 0x21f   :  { %5932 = vmatpush1.bf16.xpose.msra.mxu1 %v10524_v13  ;;  %5963 = vmatprep.mubr.bf16.mxu1 %v367_v42  ;;  %v228_v56 = vcombine.high %v130_v7, %v130_v7  ;;  %v474_v42 = vcombine.high %v10357_v43, %v10357_v43 }
 0x220   :  { %5971 = vmatprep.subr.bf16.mxu1 %v10526_v3  ;;  %v368_v3 = vpack.c.bf16 %v129_v4, %v129_v4  ;;  %v10554_v4 = vpack.c.bf16 %v10357_v43, %v10357_v43 }
 0x221   :  { %v371_v50 = vpack.c.bf16 %v228_v56, %v228_v56  ;;  %v10546_v59 = vpack.c.bf16 %v474_v42, %v474_v42 }
 0x222   :  { %11193 = vst [vmem:[#allocation58_spill] sm:$0xff] %v10554_v4 }
 0x223   :  { %11192 = vst [vmem:[#allocation57_spill] sm:$0xff] %v10546_v59 }
 0x22a   :  { %5964 = vmatmul.mubr.bf16.vlgmr.msra.gmra.mrb[0].mxu1 %v366_v12  ;;  %v131_v12 = vld [vmem:[#allocation2 + $0x168] sm:$0xff] }
 0x22b   :  { %5972 = vmatpush1.bf16.xpose.msra.mxu1 %v10534_v33  ;;  %6003 = vmatprep.mubr.bf16.mxu1 %v369_v14  ;;  %v229_v61 = vcombine.high %v131_v12, %v131_v12  ;;  %v475_v14 = vcombine.high %v10372_v41, %v10372_v41  ;;  %v370_v33 = vpack.c.bf16 %v130_v7, %v130_v7 }
 0x22c   :  { %6011 = vmatprep.subr.bf16.mxu1 %v10536_v44  ;;  %v10564_v7 = vpack.c.bf16 %v10372_v41, %v10372_v41 }
 0x22d   :  { %v373_v55 = vpack.c.bf16 %v229_v61, %v229_v61  ;;  %v10556_v56 = vpack.c.bf16 %v475_v14, %v475_v14 }
 0x236   :  { %6004 = vmatmul.mubr.bf16.vlgmr.msra.gmra.mrb[0].mxu1 %v368_v3  ;;  %v132_v3 = vld [vmem:[#allocation2 + $0x170] sm:$0xff] }
 0x237   :  { %6012 = vmatpush1.bf16.xpose.msra.mxu1 %v10544_v18  ;;  %6043 = vmatprep.mubr.bf16.mxu1 %v371_v50  ;;  %v230_v42 = vcombine.high %v132_v3, %v132_v3  ;;  %v476_v50 = vcombine.high %v10385_v39, %v10385_v39 }
 0x238   :  { %6051 = vmatprep.subr.bf16.mxu1 %v10546_v59  ;;  %v372_v59 = vpack.c.bf16 %v131_v12, %v131_v12  ;;  %v10574_v12 = vpack.c.bf16 %v10385_v39, %v10385_v39 }
 0x239   :  { %v375_v43 = vpack.c.bf16 %v230_v42, %v230_v42  ;;  %v10566_v61 = vpack.c.bf16 %v476_v50, %v476_v50 }
 0x23a   :  { %11195 = vst [vmem:[#allocation60_spill] sm:$0xff] %v10574_v12 }
 0x23b   :  { %11194 = vst [vmem:[#allocation59_spill] sm:$0xff] %v10566_v61 }
 0x242   :  { %6044 = vmatmul.mubr.bf16.vlgmr.msra.gmra.mrb[0].mxu1 %v370_v33  ;;  %v133_v33 = vld [vmem:[#allocation2 + $0x178] sm:$0xff] }
 0x243   :  { %6052 = vmatpush1.bf16.xpose.msra.mxu1 %v10554_v4  ;;  %6083 = vmatprep.mubr.bf16.mxu1 %v373_v55  ;;  %v231_v14 = vcombine.high %v133_v33, %v133_v33  ;;  %v477_v55 = vcombine.high %v10395_v11, %v10395_v11  ;;  %v374_v4 = vpack.c.bf16 %v132_v3, %v132_v3 }
 0x244   :  { %6091 = vmatprep.subr.bf16.mxu1 %v10556_v56 }
 0x245   :  { %v377_v41 = vpack.c.bf16 %v231_v14, %v231_v14  ;;  %v10576_v42 = vpack.c.bf16 %v477_v55, %v477_v55  ;;  %v6212_v55 = vlaneseq }
 0x24e   :  { %6084 = vmatmul.mubr.bf16.vlgmr.msra.gmra.mrb[0].mxu1 %v372_v59  ;;  %v134_v59 = vld [vmem:[#allocation2 + $0x180] sm:$0xff] }
 0x24f   :  { %6092 = vmatpush1.bf16.xpose.msra.mxu1 %v10564_v7  ;;  %6123 = vmatprep.mubr.bf16.mxu1 %v375_v43  ;;  %v232_v50 = vcombine.high %v134_v59, %v134_v59  ;;  %v376_v43 = vpack.c.bf16 %v133_v33, %v133_v33  ;;  %v378_v39 = vpack.c.bf16 %v134_v59, %v134_v59 }
 0x250   :  { %6131 = vmatprep.subr.bf16.mxu1 %v10566_v61  ;;  %v10582_v61 = vpack.c.bf16 %v10395_v11, %v10395_v11 }
 0x251   :  { %v379_v3 = vpack.c.bf16 %v232_v50, %v232_v50 }
 0x252   :  { %11196 = vst [vmem:[#allocation61_spill] sm:$0xff] %v10582_v61 }
 0x25a   :  { %6124 = vmatmul.mubr.bf16.vlgmr.msra.gmra.mrb[0].mxu1 %v374_v4 }
 0x25b   :  { %6132 = vmatpush1.bf16.xpose.msra.mxu1 %v10574_v12  ;;  %6163 = vmatprep.mubr.bf16.mxu1 %v377_v41  ;;  %v10585_v41 = vshrl.u32 %v6212_v55, 7 }
 0x25c   :  { %6171 = vmatprep.subr.bf16.mxu1 %v10576_v42 }
 0x25d   :  { %v6214_v12 = vsub.s32 0, %v10585_v41  ;;  %vm6223_vm2 = vcmp.lt.s32.totalorder %v10585_v41, 4 }
 0x266   :  { %6164 = vmatmul.mubr.bf16.vlgmr.msra.gmra.mrb[0].mxu1 %v376_v43 }
 0x267   :  { %6172 = vmatpush1.bf16.xpose.msra.mxu1 %v10582_v61  ;;  %6203 = vmatprep.mubr.bf16.mxu1 %v379_v3 }
 0x272   :  { %6204 = vmatmul.mubr.bf16.vlgmr.msra.gmra.mrb[0].mxu1 %v378_v39 }
 0x281   :  { %v4247_v4 = vpop.f32.mrb[0].mxu0 }
 0x282   :  { %v4249_v14 = vpop.f32.mrb[1].mxu0  ;;  %v6215_v33 = vrot.slane %v4247_v4, %v6214_v12  ;;  %v6420_v12 = vand.u32 %v10413_v62, %v10327_v28  ;;  %v6432_v28 = vand.u32 %v10413_v62, %v10365_v27  ;;  %v6276_v27 = vand.u32 %v10413_v62, %v9877_v48 }
 0x283   :  { %v6453_v48 = vand.u32 %v10413_v62, %v10444_v29  ;;  %v6480_v29 = vand.u32 %v10413_v62, %v10476_v54  ;;  %v6300_v54 = vand.u32 %v10413_v62, %v9947_v38  ;;  %v6501_v38 = vand.u32 %v10413_v62, %v10524_v13 }
 0x284   :  { %v6528_v13 = vand.u32 %v10413_v62, %v10556_v56 }
 0x345   :  { %v6205_v22 = vpop.f32.mrb[0].mxu1 }
 0x346   :  { %v6211_v10 = vmul.f32 2.0, %v6205_v22  ;;  %v6207_v15 = vpop.f32.mrb[1].mxu1  ;;  %v6258_v22 = vand.u32 %v10413_v62, %v9848_v16  ;;  %v6264_v16 = vand.u32 %v10413_v62, %v9857_v25  ;;  %v6429_v25 = vand.u32 %v10413_v62, %v10381_v1 }
 0x347   :  { %v6208_v11 = vpop.f32.mrb[2].mxu1  ;;  %v6408_v15 = vand.u32 %v10413_v62, %v10289_v47  ;;  %v6456_v1 = vand.u32 %v10413_v62, %v10436_v58  ;;  %v6288_v58 = vand.u32 %v10413_v62, %v9909_v9  ;;  %v6477_v9 = vand.u32 %v10413_v62, %v10484_v19 }
 0x348   :  { %v6216_v26 = vsub.f32 %v6215_v33, %v6211_v10  ;;  %v6209_v50 = vpop.f32.mrb[3].mxu1  ;;  %v6405_v10 = vand.u32 %v10413_v62, %v10305_v5  ;;  %6583 = vmatprep.subr.bf16.mxu0 %v6258_v22  ;;  %v6255_v5 = vand.u32 %v10413_v62, %v9854_v23  ;;  %v6417_v33 = vand.u32 %v10413_v62, %v10343_v45  ;;  %v11204_v22 = vld [vmem:[#allocation17_spill] sm:$0xff] }
 0x349   :  { %7608 = vmatprep.subr.bf16.mxu1 %v6408_v15  ;;  %v6261_v23 = vand.u32 %v10413_v62, %v9863_v34  ;;  %v6444_v45 = vand.u32 %v10413_v62, %v10403_v30  ;;  %v6267_v34 = vand.u32 %v10413_v62, %v9874_v46  ;;  %v6273_v46 = vand.u32 %v10413_v62, %v9889_v57  ;;  %v11203_v15 = vld [vmem:[#allocation16_spill] sm:$0xff] }
 0x34a   :  { %v6217_v43 = vmul.f32 0.0001, %v6216_v26  ;;  %7609 = vmatpush1.bf16.msra.mxu1 %v6405_v10  ;;  %v9801_v26 = vmov 0   ;;  %v6468_v30 = vand.u32 %v10413_v62, %v10456_v32  ;;  %v6279_v57 = vand.u32 %v10413_v62, %v9906_v6 }
 0x34b   :  { %6574 = vmatprep.mubr.bf16.mxu0 %v9801_v26  ;;  %7640 = vmatprep.mubr.bf16.mxu1 %v9801_v26  ;;  %v6285_v6 = vand.u32 %v10413_v62, %v9925_v20  ;;  %v6294_v32 = vand.u32 %v10413_v62, %v9927_v24  ;;  %v6291_v20 = vand.u32 %v10413_v62, %v9944_v35 }
 0x34c   :  { %v6226_v59 = vsel %vm6223_vm2, %v6217_v43, 0.0  ;;  %7690 = vmatprep.subr.bf16.mxu1 %v6420_v12  ;;  %v6489_v24 = vand.u32 %v10413_v62, %v10504_v0  ;;  %v6504_v19 = vand.u32 %v10413_v62, %v10516_v31  ;;  %v6297_v35 = vand.u32 %v10413_v62, %v9963_v49  ;;  %v11200_v43 = vld [vmem:[#allocation13_spill] sm:$0xff] }
 0x34d   :  { %v6228_v3 = vsel %vm6227_vm3, %v6226_v59, -inf  ;;  %v6516_v0 = vand.u32 %v10413_v62, %v10536_v44  ;;  %v6303_v49 = vand.u32 %v10413_v62, %v9982_v63  ;;  %v6312_v31 = vand.u32 %v10413_v62, %v9985_v2 }
 0x34e   :  { %6229 = vmax.xlane.f32.xlu0 %v6228_v3  ;;  %v6309_v63 = vand.u32 %v10413_v62, %v10001_v17  ;;  %v6525_v2 = vand.u32 %v10413_v62, %v10564_v7  ;;  %v6318_v44 = vand.u32 %v10413_v62, %v10003_v21  ;;  %v6315_v17 = vand.u32 %v10413_v62, %v10020_v36  ;;  %v11197_v21 = vld [vmem:[#allocation61_spill] sm:$0xff]  ;;  %v11198_v7 = vld [vmem:[#allocation11_spill] sm:$0xff]  ;;  %v11199_v36 = vld [vmem:[#allocation12_spill] sm:$0xff] }
 0x34f   :  { %v6537_v56 = vand.u32 %v10413_v62, %v11197_v21  ;;  %v6321_v50 = vand.u32 %v10413_v62, %v11199_v36  ;;  %v11201_v3 = vld [vmem:[#allocation14_spill] sm:$0xff]  ;;  %v6333_v10 = vand.u32 %v10413_v62, %v11203_v15  ;;  %v6342_v12 = vand.u32 %v10413_v62, %v11204_v22  ;;  %v11227_v21 = vld [vmem:[#allocation40_spill] sm:$0xff] }
 0x350   :  { %v11229_v36 = vld [vmem:[#allocation42_spill] sm:$0xff] }
 0x3db   :  { %v6230_v39 = vpop.xlane.xlu0 %6229 }
 0x3dc   :  { %v6231_v14 = vsub.f32 %v6226_v59, %v6230_v39  ;;  %v6330_v59 = vand.u32 %v10413_v62, %v11200_v43  ;;  %v6327_v39 = vand.u32 %v10413_v62, %v11201_v3  ;;  %v11230_v43 = vld [vmem:[#allocation43_spill] sm:$0xff]  ;;  %v9802_v3 = vmov 1983009808  }
 0x3de   :  { %v6232_v55 = vmul.f32 1.442695, %v6231_v14  ;;  %v11202_v14 = vld [vmem:[#allocation15_spill] sm:$0xff] }
 0x3e0   :  { %9721 = vpow2.f32 %v6232_v55  ;;  %v6336_v55 = vand.u32 %v10413_v62, %v11202_v14 }
 0x3ea   :  { %v9722_v40 = vpop.eup %9721 }
 0x3eb   :  { %v6234_v61 = vsel %vm6227_vm3, %v9722_v40, 0.0 }
 0x3ec   :  { %6235 = vadd.xlane.f32.xlu0 %v6234_v61 }
 0x479   :  { %v6236_v61 = vpop.xlane.xlu0 %6235 }
 0x47a   :  { %9723 = vrcp.f32 %v6236_v61  ;;  %v11205_v61 = vld [vmem:[#allocation18_spill] sm:$0xff] }
 0x484   :  { %v9724_v47 = vpop.eup %9723 }
 0x485   :  { %v6238_v4 = vmul.f32 %v9724_v47, %v9722_v40  ;;  %v6270_v40 = vand.u32 %v10413_v62, %v9865_v37  ;;  %v6441_v37 = vand.u32 %v10413_v62, %v10417_v53  ;;  %v6282_v53 = vand.u32 %v10413_v62, %v9891_v60 }
 0x486   :  { %v6465_v60 = vand.u32 %v10413_v62, %v10464_v8  ;;  %v6492_v8 = vand.u32 %v10413_v62, %v10496_v51  ;;  %v6306_v51 = vand.u32 %v10413_v62, %v9965_v52  ;;  %v6513_v52 = vand.u32 %v10413_v62, %v10544_v18 }
 0x487   :  { %v10603_v11 = vpack.c.bf16 %v6238_v4, %v6238_v4  ;;  %v6540_v18 = vand.u32 %v10413_v62, %v10576_v42  ;;  %v6324_v42 = vand.u32 %v10413_v62, %v11198_v7  ;;  %v6339_v47 = vand.u32 %v10413_v62, %v11205_v61  ;;  %v11206_v4 = vld [vmem:[#allocation19_spill] sm:$0xff]  ;;  %v11228_v7 = vld [vmem:[#allocation41_spill] sm:$0xff] }
 0x489   :  { %9229 = vmatmul.mubr.msk.bf16.vlgmr.msra.gmra.mrb[4].mxu0 %vm6240_vm4, %v10603_v11  ;;  %9255 = vmatmul.mubr.msk.bf16.vlgmr.msra.gmra.mrb[4].mxu1 %vm6240_vm4, %v10603_v11 }
 0x48a   :  { %6584 = vmatpush1.bf16.msra.mxu0 %v6255_v5  ;;  %7691 = vmatpush1.bf16.msra.mxu1 %v6417_v33  ;;  %v6348_v5 = vand.u32 %v10413_v62, %v11206_v4  ;;  %v11207_v33 = vld [vmem:[#allocation20_spill] sm:$0xff] }
 0x48b   :  { %6615 = vmatprep.mubr.bf16.mxu0 %v9801_v26  ;;  %7722 = vmatprep.mubr.bf16.mxu1 %v9801_v26  ;;  %v11231_v4 = vld [vmem:[#allocation44_spill] sm:$0xff] }
 0x48c   :  { %6624 = vmatprep.subr.bf16.mxu0 %v6264_v16  ;;  %7772 = vmatprep.subr.bf16.mxu1 %v6432_v28  ;;  %v6345_v16 = vand.u32 %v10413_v62, %v11207_v33  ;;  %v11208_v28 = vld [vmem:[#allocation21_spill] sm:$0xff] }
 0x491   :  { %9230 = vmatmul.mubr.msk.bf16.vlgmr.msra.gmra.mrb[8].mxu0 %vm6240_vm4, %v10603_v11  ;;  %9257 = vmatmul.mubr.msk.bf16.vlgmr.msra.gmra.mrb[8].mxu1 %vm6240_vm4, %v10603_v11 }
 0x492   :  { %6625 = vmatpush1.bf16.msra.mxu0 %v6261_v23  ;;  %7773 = vmatpush1.bf16.msra.mxu1 %v6429_v25  ;;  %v6354_v23 = vand.u32 %v10413_v62, %v11208_v28  ;;  %v11209_v25 = vld [vmem:[#allocation22_spill] sm:$0xff]  ;;  %v11232_v28 = vld [vmem:[#allocation45_spill] sm:$0xff] }
 0x493   :  { %6656 = vmatprep.mubr.bf16.mxu0 %v9801_v26  ;;  %7804 = vmatprep.mubr.bf16.mxu1 %v9801_v26 }
 0x494   :  { %6665 = vmatprep.subr.bf16.mxu0 %v6270_v40  ;;  %7854 = vmatprep.subr.bf16.mxu1 %v6444_v45  ;;  %v6351_v40 = vand.u32 %v10413_v62, %v11209_v25  ;;  %v11210_v45 = vld [vmem:[#allocation23_spill] sm:$0xff] }
 0x499   :  { %9231 = vmatmul.mubr.msk.bf16.vlgmr.msra.gmra.mrb[12].mxu0 %vm6240_vm4, %v10603_v11  ;;  %9259 = vmatmul.mubr.msk.bf16.vlgmr.msra.gmra.mrb[12].mxu1 %vm6240_vm4, %v10603_v11 }
 0x49a   :  { %6666 = vmatpush1.bf16.msra.mxu0 %v6267_v34  ;;  %7855 = vmatpush1.bf16.msra.mxu1 %v6441_v37  ;;  %v6360_v34 = vand.u32 %v10413_v62, %v11210_v45  ;;  %v11211_v37 = vld [vmem:[#allocation24_spill] sm:$0xff] }
 0x49b   :  { %6697 = vmatprep.mubr.bf16.mxu0 %v9801_v26  ;;  %7886 = vmatprep.mubr.bf16.mxu1 %v9801_v26 }
 0x49c   :  { %6706 = vmatprep.subr.bf16.mxu0 %v6276_v27  ;;  %7936 = vmatprep.subr.bf16.mxu1 %v6456_v1  ;;  %v6357_v27 = vand.u32 %v10413_v62, %v11211_v37  ;;  %v11212_v1 = vld [vmem:[#allocation25_spill] sm:$0xff] }
 0x4a1   :  { %9232 = vmatmul.mubr.msk.bf16.vlgmr.msra.gmra.mrb[16].mxu0 %vm6240_vm4, %v10603_v11  ;;  %9261 = vmatmul.mubr.msk.bf16.vlgmr.msra.gmra.mrb[16].mxu1 %vm6240_vm4, %v10603_v11 }
 0x4a2   :  { %6707 = vmatpush1.bf16.msra.mxu0 %v6273_v46  ;;  %7937 = vmatpush1.bf16.msra.mxu1 %v6453_v48  ;;  %v6366_v46 = vand.u32 %v10413_v62, %v11212_v1  ;;  %v11213_v48 = vld [vmem:[#allocation26_spill] sm:$0xff] }
 0x4a3   :  { %6738 = vmatprep.mubr.bf16.mxu0 %v9801_v26  ;;  %7968 = vmatprep.mubr.bf16.mxu1 %v9801_v26 }
 0x4a4   :  { %6747 = vmatprep.subr.bf16.mxu0 %v6282_v53  ;;  %8018 = vmatprep.subr.bf16.mxu1 %v6468_v30  ;;  %v6363_v53 = vand.u32 %v10413_v62, %v11213_v48  ;;  %v11214_v30 = vld [vmem:[#allocation27_spill] sm:$0xff] }
 0x4a9   :  { %9233 = vmatmul.mubr.msk.bf16.vlgmr.msra.gmra.mrb[20].mxu0 %vm6240_vm4, %v10603_v11  ;;  %9263 = vmatmul.mubr.msk.bf16.vlgmr.msra.gmra.mrb[20].mxu1 %vm6240_vm4, %v10603_v11 }
 0x4aa   :  { %6748 = vmatpush1.bf16.msra.mxu0 %v6279_v57  ;;  %8019 = vmatpush1.bf16.msra.mxu1 %v6465_v60  ;;  %v6372_v57 = vand.u32 %v10413_v62, %v11214_v30  ;;  %v11215_v60 = vld [vmem:[#allocation28_spill] sm:$0xff]  ;;  %v11233_v30 = vld [vmem:[#allocation46_spill] sm:$0xff] }
 0x4ab   :  { %6779 = vmatprep.mubr.bf16.mxu0 %v9801_v26  ;;  %8050 = vmatprep.mubr.bf16.mxu1 %v9801_v26 }
 0x4ac   :  { %6788 = vmatprep.subr.bf16.mxu0 %v6288_v58  ;;  %8100 = vmatprep.subr.bf16.mxu1 %v6480_v29  ;;  %v6369_v58 = vand.u32 %v10413_v62, %v11215_v60  ;;  %v11216_v29 = vld [vmem:[#allocation29_spill] sm:$0xff] }
 0x4b1   :  { %9234 = vmatmul.mubr.msk.bf16.vlgmr.msra.gmra.mrb[24].mxu0 %vm6240_vm4, %v10603_v11  ;;  %9265 = vmatmul.mubr.msk.bf16.vlgmr.msra.gmra.mrb[24].mxu1 %vm6240_vm4, %v10603_v11 }
 0x4b2   :  { %6789 = vmatpush1.bf16.msra.mxu0 %v6285_v6  ;;  %8101 = vmatpush1.bf16.msra.mxu1 %v6477_v9  ;;  %v6378_v6 = vand.u32 %v10413_v62, %v11216_v29  ;;  %v11217_v9 = vld [vmem:[#allocation30_spill] sm:$0xff]  ;;  %v11234_v29 = vld [vmem:[#allocation47_spill] sm:$0xff] }
 0x4b3   :  { %6820 = vmatprep.mubr.bf16.mxu0 %v9801_v26  ;;  %8132 = vmatprep.mubr.bf16.mxu1 %v9801_v26 }
 0x4b4   :  { %6829 = vmatprep.subr.bf16.mxu0 %v6294_v32  ;;  %8182 = vmatprep.subr.bf16.mxu1 %v6492_v8  ;;  %v6375_v32 = vand.u32 %v10413_v62, %v11217_v9  ;;  %v11218_v8 = vld [vmem:[#allocation31_spill] sm:$0xff] }
 0x4b9   :  { %9235 = vmatmul.mubr.msk.bf16.vlgmr.msra.gmra.mrb[28].mxu0 %vm6240_vm4, %v10603_v11  ;;  %9267 = vmatmul.mubr.msk.bf16.vlgmr.msra.gmra.mrb[28].mxu1 %vm6240_vm4, %v10603_v11 }
 0x4ba   :  { %6830 = vmatpush1.bf16.msra.mxu0 %v6291_v20  ;;  %8183 = vmatpush1.bf16.msra.mxu1 %v6489_v24  ;;  %v6384_v20 = vand.u32 %v10413_v62, %v11218_v8  ;;  %v11219_v24 = vld [vmem:[#allocation32_spill] sm:$0xff] }
 0x4bb   :  { %6861 = vmatprep.mubr.bf16.mxu0 %v9801_v26  ;;  %8214 = vmatprep.mubr.bf16.mxu1 %v9801_v26 }
 0x4bc   :  { %6870 = vmatprep.subr.bf16.mxu0 %v6300_v54  ;;  %8264 = vmatprep.subr.bf16.mxu1 %v6504_v19  ;;  %v6381_v54 = vand.u32 %v10413_v62, %v11219_v24  ;;  %v11220_v19 = vld [vmem:[#allocation33_spill] sm:$0xff] }
 0x4c1   :  { %9236 = vmatmul.mubr.msk.bf16.vlgmr.msra.gmra.mrb[32].mxu0 %vm6240_vm4, %v10603_v11  ;;  %9269 = vmatmul.mubr.msk.bf16.vlgmr.msra.gmra.mrb[32].mxu1 %vm6240_vm4, %v10603_v11 }
 0x4c2   :  { %6871 = vmatpush1.bf16.msra.mxu0 %v6297_v35  ;;  %8265 = vmatpush1.bf16.msra.mxu1 %v6501_v38  ;;  %v6390_v35 = vand.u32 %v10413_v62, %v11220_v19  ;;  %v11221_v38 = vld [vmem:[#allocation34_spill] sm:$0xff] }
 0x4c3   :  { %6902 = vmatprep.mubr.bf16.mxu0 %v9801_v26  ;;  %8296 = vmatprep.mubr.bf16.mxu1 %v9801_v26 }
 0x4c4   :  { %6911 = vmatprep.subr.bf16.mxu0 %v6306_v51  ;;  %8346 = vmatprep.subr.bf16.mxu1 %v6516_v0  ;;  %v6387_v51 = vand.u32 %v10413_v62, %v11221_v38  ;;  %v11222_v0 = vld [vmem:[#allocation35_spill] sm:$0xff] }
 0x4c9   :  { %9237 = vmatmul.mubr.msk.bf16.vlgmr.msra.gmra.mrb[36].mxu0 %vm6240_vm4, %v10603_v11  ;;  %9271 = vmatmul.mubr.msk.bf16.vlgmr.msra.gmra.mrb[36].mxu1 %vm6240_vm4, %v10603_v11 }
 0x4ca   :  { %6912 = vmatpush1.bf16.msra.mxu0 %v6303_v49  ;;  %8347 = vmatpush1.bf16.msra.mxu1 %v6513_v52  ;;  %v6396_v49 = vand.u32 %v10413_v62, %v11222_v0  ;;  %v11223_v52 = vld [vmem:[#allocation36_spill] sm:$0xff] }
 0x4cb   :  { %6943 = vmatprep.mubr.bf16.mxu0 %v9801_v26  ;;  %8378 = vmatprep.mubr.bf16.mxu1 %v9801_v26  ;;  %v11235_v0 = vld [vmem:[#allocation48_spill] sm:$0xff] }
 0x4cc   :  { %6952 = vmatprep.subr.bf16.mxu0 %v6312_v31  ;;  %8428 = vmatprep.subr.bf16.mxu1 %v6528_v13  ;;  %v6393_v31 = vand.u32 %v10413_v62, %v11223_v52  ;;  %v11224_v13 = vld [vmem:[#allocation37_spill] sm:$0xff] }
 0x4d1   :  { %9238 = vmatmul.mubr.msk.bf16.vlgmr.msra.gmra.mrb[40].mxu0 %vm6240_vm4, %v10603_v11  ;;  %9273 = vmatmul.mubr.msk.bf16.vlgmr.msra.gmra.mrb[40].mxu1 %vm6240_vm4, %v10603_v11 }
 0x4d2   :  { %6953 = vmatpush1.bf16.msra.mxu0 %v6309_v63  ;;  %8429 = vmatpush1.bf16.msra.mxu1 %v6525_v2  ;;  %v6402_v63 = vand.u32 %v10413_v62, %v11224_v13  ;;  %v11225_v2 = vld [vmem:[#allocation38_spill] sm:$0xff]  ;;  %v11236_v13 = vld [vmem:[#allocation49_spill] sm:$0xff] }
 0x4d3   :  { %6984 = vmatprep.mubr.bf16.mxu0 %v9801_v26  ;;  %8460 = vmatprep.mubr.bf16.mxu1 %v9801_v26 }
 0x4d4   :  { %6993 = vmatprep.subr.bf16.mxu0 %v6318_v44  ;;  %8510 = vmatprep.subr.bf16.mxu1 %v6540_v18  ;;  %v6399_v44 = vand.u32 %v10413_v62, %v11225_v2  ;;  %v11226_v18 = vld [vmem:[#allocation39_spill] sm:$0xff] }
 0x4d9   :  { %9239 = vmatmul.mubr.msk.bf16.vlgmr.msra.gmra.mrb[44].mxu0 %vm6240_vm4, %v10603_v11  ;;  %9275 = vmatmul.mubr.msk.bf16.vlgmr.msra.gmra.mrb[44].mxu1 %vm6240_vm4, %v10603_v11 }
 0x4da   :  { %6994 = vmatpush1.bf16.msra.mxu0 %v6315_v17  ;;  %8511 = vmatpush1.bf16.msra.mxu1 %v6537_v56  ;;  %v6414_v17 = vand.u32 %v10413_v62, %v11226_v18  ;;  %v6411_v56 = vand.u32 %v10413_v62, %v11227_v21 }
 0x4db   :  { %7025 = vmatprep.mubr.bf16.mxu0 %v9801_v26  ;;  %8542 = vmatprep.mubr.bf16.mxu1 %v9801_v26 }
 0x4dc   :  { %7034 = vmatprep.subr.bf16.mxu0 %v6324_v42  ;;  %v6426_v42 = vand.u32 %v10413_v62, %v11228_v7 }
 0x4e1   :  { %9240 = vmatmul.mubr.msk.bf16.vlgmr.msra.gmra.mrb[48].mxu0 %vm6240_vm4, %v10603_v11  ;;  %9277 = vmatmul.mubr.msk.bf16.vlgmr.msra.gmra.mrb[48].mxu1 %vm6240_vm4, %v10603_v11 }
 0x4e2   :  { %7035 = vmatpush1.bf16.msra.mxu0 %v6321_v50  ;;  %7066 = vmatprep.mubr.bf16.mxu0 %v9801_v26  ;;  %v6423_v50 = vand.u32 %v10413_v62, %v11229_v36  ;;  %v11237_v36 = vld [vmem:[#allocation50_spill] sm:$0xff] }
 0x4e3   :  { %7075 = vmatprep.subr.bf16.mxu0 %v6330_v59  ;;  %v6438_v59 = vand.u32 %v10413_v62, %v11230_v43 }
 0x4e9   :  { %9241 = vmatmul.mubr.msk.bf16.vlgmr.msra.gmra.mrb[52].mxu0 %vm6240_vm4, %v10603_v11 }
 0x4ea   :  { %7076 = vmatpush1.bf16.msra.mxu0 %v6327_v39  ;;  %7107 = vmatprep.mubr.bf16.mxu0 %v9801_v26  ;;  %v8750_v39 = vunpack.c.l.s4 %v9802_v3  ;;  %v11238_v3 = vld [vmem:[#allocation51_spill] sm:$0xff] }
 0x4eb   :  { %7116 = vmatprep.subr.bf16.mxu0 %v6336_v55 }
 0x4ec   :  { %v8751_v25 = vunpack.c.0.s8 %v8750_v39  ;;  %v6486_v39 = vand.u32 %v10413_v62, %v11238_v3  ;;  %v11244_v3 = vld [vmem:[#allocation57_spill] sm:$0xff] }
 0x4f1   :  { %9242 = vmatmul.mubr.msk.bf16.vlgmr.msra.gmra.mrb[56].mxu0 %vm6240_vm4, %v10603_v11 }
 0x4f2   :  { %7117 = vmatpush1.bf16.msra.mxu0 %v6333_v10  ;;  %7148 = vmatprep.mubr.bf16.mxu0 %v9801_v26 }
 0x4f3   :  { %7157 = vmatprep.subr.bf16.mxu0 %v6342_v12 }
 0x4f9   :  { %9243 = vmatmul.mubr.msk.bf16.vlgmr.msra.gmra.mrb[60].mxu0 %vm6240_vm4, %v10603_v11 }
 0x4fa   :  { %7158 = vmatpush1.bf16.msra.mxu0 %v6339_v47  ;;  %7189 = vmatprep.mubr.bf16.mxu0 %v9801_v26 }
 0x4fb   :  { %7198 = vmatprep.subr.bf16.mxu0 %v6348_v5  ;;  %v6435_v5 = vand.u32 %v10413_v62, %v11231_v4 }
 0x501   :  { %9244 = vmatmul.mubr.msk.bf16.vlgmr.msra.gmra.mrb[64].mxu0 %vm6240_vm4, %v10603_v11 }
 0x502   :  { %7199 = vmatpush1.bf16.msra.mxu0 %v6345_v16  ;;  %7230 = vmatprep.mubr.bf16.mxu0 %v9801_v26 }
 0x503   :  { %7239 = vmatprep.subr.bf16.mxu0 %v6354_v23  ;;  %v6450_v23 = vand.u32 %v10413_v62, %v11232_v28 }
 0x509   :  { %9245 = vmatmul.mubr.msk.bf16.vlgmr.msra.gmra.mrb[68].mxu0 %vm6240_vm4, %v10603_v11 }
 0x50a   :  { %7240 = vmatpush1.bf16.msra.mxu0 %v6351_v40  ;;  %7271 = vmatprep.mubr.bf16.mxu0 %v9801_v26  ;;  %v10881_v40 = vsub.s32 %v8751_v25, %v10585_v41  ;;  %v6462_v41 = vand.u32 %v10413_v62, %v11234_v29  ;;  %v11239_v25 = vld [vmem:[#allocation52_spill] sm:$0xff] }
 0x50b   :  { %7280 = vmatprep.subr.bf16.mxu0 %v6360_v34 }
 0x511   :  { %9246 = vmatmul.mubr.msk.bf16.vlgmr.msra.gmra.mrb[72].mxu0 %vm6240_vm4, %v10603_v11 }
 0x512   :  { %7281 = vmatpush1.bf16.msra.mxu0 %v6357_v27  ;;  %7312 = vmatprep.mubr.bf16.mxu0 %v9801_v26 }
 0x513   :  { %7321 = vmatprep.subr.bf16.mxu0 %v6366_v46 }
 0x519   :  { %9247 = vmatmul.mubr.msk.bf16.vlgmr.msra.gmra.mrb[76].mxu0 %vm6240_vm4, %v10603_v11 }
 0x51a   :  { %7322 = vmatpush1.bf16.msra.mxu0 %v6363_v53  ;;  %7353 = vmatprep.mubr.bf16.mxu0 %v9801_v26 }
 0x51b   :  { %7362 = vmatprep.subr.bf16.mxu0 %v6372_v57  ;;  %v6447_v57 = vand.u32 %v10413_v62, %v11233_v30 }
 0x521   :  { %9248 = vmatmul.mubr.msk.bf16.vlgmr.msra.gmra.mrb[80].mxu0 %vm6240_vm4, %v10603_v11 }
 0x522   :  { %7363 = vmatpush1.bf16.msra.mxu0 %v6369_v58  ;;  %7394 = vmatprep.mubr.bf16.mxu0 %v9801_v26 }
 0x523   :  { %7403 = vmatprep.subr.bf16.mxu0 %v6378_v6 }
 0x529   :  { %9249 = vmatmul.mubr.msk.bf16.vlgmr.msra.gmra.mrb[84].mxu0 %vm6240_vm4, %v10603_v11 }
 0x52a   :  { %7404 = vmatpush1.bf16.msra.mxu0 %v6375_v32  ;;  %7435 = vmatprep.mubr.bf16.mxu0 %v9801_v26 }
 0x52b   :  { %7444 = vmatprep.subr.bf16.mxu0 %v6384_v20 }
 0x531   :  { %9250 = vmatmul.mubr.msk.bf16.vlgmr.msra.gmra.mrb[88].mxu0 %vm6240_vm4, %v10603_v11 }
 0x532   :  { %7445 = vmatpush1.bf16.msra.mxu0 %v6381_v54  ;;  %7476 = vmatprep.mubr.bf16.mxu0 %v9801_v26 }
 0x533   :  { %7485 = vmatprep.subr.bf16.mxu0 %v6390_v35 }
 0x539   :  { %9251 = vmatmul.mubr.msk.bf16.vlgmr.msra.gmra.mrb[92].mxu0 %vm6240_vm4, %v10603_v11 }
 0x53a   :  { %7486 = vmatpush1.bf16.msra.mxu0 %v6387_v51  ;;  %7517 = vmatprep.mubr.bf16.mxu0 %v9801_v26 }
 0x53b   :  { %7526 = vmatprep.subr.bf16.mxu0 %v6396_v49  ;;  %v6459_v49 = vand.u32 %v10413_v62, %v11235_v0 }
 0x541   :  { %9252 = vmatmul.mubr.msk.bf16.vlgmr.msra.gmra.mrb[96].mxu0 %vm6240_vm4, %v10603_v11 }
 0x542   :  { %7527 = vmatpush1.bf16.msra.mxu0 %v6393_v31  ;;  %7558 = vmatprep.mubr.bf16.mxu0 %v9801_v26 }
 0x543   :  { %7567 = vmatprep.subr.bf16.mxu0 %v6402_v63  ;;  %v6474_v63 = vand.u32 %v10413_v62, %v11236_v13 }
 0x549   :  { %9253 = vmatmul.mubr.msk.bf16.vlgmr.msra.gmra.mrb[100].mxu0 %vm6240_vm4, %v10603_v11 }
 0x54a   :  { %7568 = vmatpush1.bf16.msra.mxu0 %v6399_v44  ;;  %7599 = vmatprep.mubr.bf16.mxu0 %v9801_v26 }
 0x54b   :  { %7649 = vmatprep.subr.bf16.mxu0 %v6414_v17 }
 0x551   :  { %9254 = vmatmul.mubr.msk.bf16.vlgmr.msra.gmra.mrb[104].mxu0 %vm6240_vm4, %v10603_v11 }
 0x552   :  { %7650 = vmatpush1.bf16.msra.mxu0 %v6411_v56  ;;  %7681 = vmatprep.mubr.bf16.mxu0 %v9801_v26 }
 0x553   :  { %7731 = vmatprep.subr.bf16.mxu0 %v6426_v42 }
 0x559   :  { %9256 = vmatmul.mubr.msk.bf16.vlgmr.msra.gmra.mrb[108].mxu0 %vm6240_vm4, %v10603_v11 }
 0x55a   :  { %7732 = vmatpush1.bf16.msra.mxu0 %v6423_v50  ;;  %7763 = vmatprep.mubr.bf16.mxu0 %v9801_v26  ;;  %v6471_v50 = vand.u32 %v10413_v62, %v11237_v36  ;;  %v11243_v36 = vld [vmem:[#allocation56_spill] sm:$0xff] }
 0x55b   :  { %7813 = vmatprep.subr.bf16.mxu0 %v6438_v59 }
 0x55c   :  { %v6576_v14 = vpop.f32.mrb[4].mxu0  ;;  %v10867_v55 = vpop.f32.mrb[4].mxu1 }
 0x55d   :  { %v6578_v15 = vpop.f32.mrb[5].mxu0  ;;  %v10869_v10 = vpop.f32.mrb[5].mxu1 }
 0x55e   :  { %v9278_v22 = vpack.c.bf16 %v6578_v15, %v6576_v14  ;;  %v9304_v12 = vpack.c.bf16 %v10869_v10, %v10867_v55  ;;  %v6580_v61 = vpop.f32.mrb[6].mxu0  ;;  %v7646_v47 = vpop.f32.mrb[6].mxu1 }
 0x55f   :  { %v6581_v33 = vpop.f32.mrb[7].mxu0  ;;  %v7647_v16 = vpop.f32.mrb[7].mxu1 }
 0x560   :  { %v8755_v6 = vrot.slane %v9278_v22, %v10881_v40 }
 0x561   :  { %9258 = vmatmul.mubr.msk.bf16.vlgmr.msra.gmra.mrb[112].mxu0 %vm6240_vm4, %v10603_v11 }
 0x562   :  { %7814 = vmatpush1.bf16.msra.mxu0 %v6435_v5  ;;  %7845 = vmatprep.mubr.bf16.mxu0 %v9801_v26 }
 0x563   :  { %7895 = vmatprep.subr.bf16.mxu0 %v6450_v23 }
 0x564   :  { %v6617_v45 = vpop.f32.mrb[8].mxu0  ;;  %v10883_v34 = vpop.f32.mrb[8].mxu1 }
 0x565   :  { %v6619_v37 = vpop.f32.mrb[9].mxu0  ;;  %v10885_v27 = vpop.f32.mrb[9].mxu1 }
 0x566   :  { %v9279_v1 = vpack.c.bf16 %v6619_v37, %v6617_v45  ;;  %v9306_v46 = vpack.c.bf16 %v10885_v27, %v10883_v34  ;;  %v6621_v48 = vpop.f32.mrb[10].mxu0  ;;  %v7728_v53 = vpop.f32.mrb[10].mxu1  ;;  %v6483_v45 = vand.u32 %v10413_v62, %v11239_v25  ;;  %v11245_v25 = vld [vmem:[#allocation58_spill] sm:$0xff] }
 0x567   :  { %v6622_v60 = vpop.f32.mrb[11].mxu0  ;;  %v7729_v58 = vpop.f32.mrb[11].mxu1  ;;  %v11240_v48 = vld [vmem:[#allocation53_spill] sm:$0xff] }
 0x568   :  { %v8762_v9 = vrot.slane %v9279_v1, %v10881_v40  ;;  %v6498_v53 = vand.u32 %v10413_v62, %v11240_v48  ;;  %v11246_v48 = vld [vmem:[#allocation59_spill] sm:$0xff] }
 0x569   :  { %9260 = vmatmul.mubr.msk.bf16.vlgmr.msra.gmra.mrb[116].mxu0 %vm6240_vm4, %v10603_v11 }
 0x56a   :  { %v8763_v32 = vcombine.low %v8755_v6, %v8762_v9  ;;  %7896 = vmatpush1.bf16.msra.mxu0 %v6447_v57  ;;  %7927 = vmatprep.mubr.bf16.mxu0 %v9801_v26 }
 0x56b   :  { %7977 = vmatprep.subr.bf16.mxu0 %v6462_v41 }
 0x56c   :  { %9188 = vst [vmem:[#allocation7] sm:$0xff] %v8763_v32  ;;  %v6658_v8 = vpop.f32.mrb[12].mxu0  ;;  %v10898_v20 = vpop.f32.mrb[12].mxu1  ;;  %v11241_v32 = vld [vmem:[#allocation54_spill] sm:$0xff] }
 0x56d   :  { %v6660_v24 = vpop.f32.mrb[13].mxu0  ;;  %v10900_v54 = vpop.f32.mrb[13].mxu1 }
 0x56e   :  { %v9280_v19 = vpack.c.bf16 %v6660_v24, %v6658_v8  ;;  %v9308_v35 = vpack.c.bf16 %v10900_v54, %v10898_v20  ;;  %v6662_v38 = vpop.f32.mrb[14].mxu0  ;;  %v7810_v51 = vpop.f32.mrb[14].mxu1  ;;  %v6495_v8 = vand.u32 %v10413_v62, %v11241_v32 }
 0x56f   :  { %v6663_v52 = vpop.f32.mrb[15].mxu0  ;;  %v7811_v31 = vpop.f32.mrb[15].mxu1  ;;  %v11242_v38 = vld [vmem:[#allocation55_spill] sm:$0xff] }
 0x570   :  { %v8772_v14 = vrot.slane %v9280_v19, %v10881_v40  ;;  %v6510_v51 = vand.u32 %v10413_v62, %v11242_v38 }
 0x571   :  { %9262 = vmatmul.mubr.msk.bf16.vlgmr.msra.gmra.mrb[120].mxu0 %vm6240_vm4, %v10603_v11 }
 0x572   :  { %7978 = vmatpush1.bf16.msra.mxu0 %v6459_v49  ;;  %8009 = vmatprep.mubr.bf16.mxu0 %v9801_v26 }
 0x573   :  { %8059 = vmatprep.subr.bf16.mxu0 %v6474_v63 }
 0x574   :  { %v6699_v2 = vpop.f32.mrb[16].mxu0  ;;  %v10911_v44 = vpop.f32.mrb[16].mxu1 }
 0x575   :  { %v6701_v18 = vpop.f32.mrb[17].mxu0  ;;  %v10913_v17 = vpop.f32.mrb[17].mxu1 }
 0x576   :  { %v9281_v21 = vpack.c.bf16 %v6701_v18, %v6699_v2  ;;  %v9310_v56 = vpack.c.bf16 %v10913_v17, %v10911_v44  ;;  %v6703_v7 = vpop.f32.mrb[18].mxu0  ;;  %v7892_v42 = vpop.f32.mrb[18].mxu1 }
 0x577   :  { %v6704_v43 = vpop.f32.mrb[19].mxu0  ;;  %v7893_v59 = vpop.f32.mrb[19].mxu1 }
 0x578   :  { %v8779_v15 = vrot.slane %v9281_v21, %v10881_v40 }
 0x579   :  { %9264 = vmatmul.mubr.msk.bf16.vlgmr.msra.gmra.mrb[124].mxu0 %vm6240_vm4, %v10603_v11 }
 0x57a   :  { %v8780_v22 = vcombine.low %v8772_v14, %v8779_v15  ;;  %8060 = vmatpush1.bf16.msra.mxu0 %v6471_v50  ;;  %8091 = vmatprep.mubr.bf16.mxu0 %v9801_v26  ;;  %v6507_v50 = vand.u32 %v10413_v62, %v11243_v36 }
 0x57b   :  { %8141 = vmatprep.subr.bf16.mxu0 %v6486_v39  ;;  %v6522_v39 = vand.u32 %v10413_v62, %v11244_v3 }
 0x57c   :  { %9189 = vst [vmem:[#allocation7 + $0x8] sm:$0xff] %v8780_v22  ;;  %v6740_v61 = vpop.f32.mrb[20].mxu0  ;;  %v10926_v47 = vpop.f32.mrb[20].mxu1 }
 0x57d   :  { %v6742_v4 = vpop.f32.mrb[21].mxu0  ;;  %v10928_v5 = vpop.f32.mrb[21].mxu1 }
 0x57e   :  { %v9282_v33 = vpack.c.bf16 %v6742_v4, %v6740_v61  ;;  %v9312_v16 = vpack.c.bf16 %v10928_v5, %v10926_v47  ;;  %v6744_v28 = vpop.f32.mrb[22].mxu0  ;;  %v7974_v23 = vpop.f32.mrb[22].mxu1 }
 0x57f   :  { %v6745_v37 = vpop.f32.mrb[23].mxu0  ;;  %v7975_v1 = vpop.f32.mrb[23].mxu1 }
 0x580   :  { %v8789_v0 = vrot.slane %v9282_v33, %v10881_v40 }
 0x581   :  { %9266 = vmatmul.mubr.msk.bf16.vlgmr.msra.gmra.mrb[128].mxu0 %vm6240_vm4, %v10603_v11 }
 0x582   :  { %8142 = vmatpush1.bf16.msra.mxu0 %v6483_v45  ;;  %8173 = vmatprep.mubr.bf16.mxu0 %v9801_v26  ;;  %v6519_v45 = vand.u32 %v10413_v62, %v11245_v25 }
 0x583   :  { %8223 = vmatprep.subr.bf16.mxu0 %v6498_v53  ;;  %v6534_v53 = vand.u32 %v10413_v62, %v11246_v48 }
 0x584   :  { %v6781_v30 = vpop.f32.mrb[24].mxu0  ;;  %v10939_v57 = vpop.f32.mrb[24].mxu1 }
 0x585   :  { %v6783_v60 = vpop.f32.mrb[25].mxu0  ;;  %v10941_v58 = vpop.f32.mrb[25].mxu1 }
 0x586   :  { %v9283_v29 = vpack.c.bf16 %v6783_v60, %v6781_v30  ;;  %v9314_v41 = vpack.c.bf16 %v10941_v58, %v10939_v57  ;;  %v6785_v6 = vpop.f32.mrb[26].mxu0  ;;  %v8056_v9 = vpop.f32.mrb[26].mxu1 }
 0x587   :  { %v6786_v24 = vpop.f32.mrb[27].mxu0  ;;  %v8057_v19 = vpop.f32.mrb[27].mxu1 }
 0x588   :  { %v8796_v49 = vrot.slane %v9283_v29, %v10881_v40 }
 0x589   :  { %9268 = vmatmul.mubr.msk.bf16.vlgmr.msra.gmra.mrb[132].mxu0 %vm6240_vm4, %v10603_v11 }
 0x58a   :  { %v8797_v52 = vcombine.low %v8789_v0, %v8796_v49  ;;  %8224 = vmatpush1.bf16.msra.mxu0 %v6495_v8  ;;  %8255 = vmatprep.mubr.bf16.mxu0 %v9801_v26  ;;  %v11247_v0 = vld [vmem:[#allocation60_spill] sm:$0xff] }
 0x58b   :  { %8305 = vmatprep.subr.bf16.mxu0 %v6510_v51  ;;  %v6531_v49 = vand.u32 %v10413_v62, %v11247_v0 }
 0x58c   :  { %9190 = vst [vmem:[#allocation7 + $0x10] sm:$0xff] %v8797_v52  ;;  %v6822_v31 = vpop.f32.mrb[28].mxu0  ;;  %v10954_v13 = vpop.f32.mrb[28].mxu1 }
 0x58d   :  { %v6824_v63 = vpop.f32.mrb[29].mxu0  ;;  %v10956_v2 = vpop.f32.mrb[29].mxu1 }
 0x58e   :  { %v9284_v18 = vpack.c.bf16 %v6824_v63, %v6822_v31  ;;  %v9316_v21 = vpack.c.bf16 %v10956_v2, %v10954_v13  ;;  %v6826_v7 = vpop.f32.mrb[30].mxu0  ;;  %v8138_v42 = vpop.f32.mrb[30].mxu1 }
 0x58f   :  { %v6827_v43 = vpop.f32.mrb[31].mxu0  ;;  %v8139_v59 = vpop.f32.mrb[31].mxu1 }
 0x590   :  { %v8806_v30 = vrot.slane %v9284_v18, %v10881_v40 }
 0x591   :  { %9270 = vmatmul.mubr.msk.bf16.vlgmr.msra.gmra.mrb[136].mxu0 %vm6240_vm4, %v10603_v11 }
 0x592   :  { %8306 = vmatpush1.bf16.msra.mxu0 %v6507_v50  ;;  %8337 = vmatprep.mubr.bf16.mxu0 %v9801_v26 }
 0x593   :  { %8387 = vmatprep.subr.bf16.mxu0 %v6522_v39 }
 0x594   :  { %v6863_v14 = vpop.f32.mrb[32].mxu0  ;;  %v10967_v15 = vpop.f32.mrb[32].mxu1 }
 0x595   :  { %v6865_v22 = vpop.f32.mrb[33].mxu0  ;;  %v10969_v61 = vpop.f32.mrb[33].mxu1 }
 0x596   :  { %v9285_v4 = vpack.c.bf16 %v6865_v22, %v6863_v14  ;;  %v9318_v33 = vpack.c.bf16 %v10969_v61, %v10967_v15  ;;  %v6867_v28 = vpop.f32.mrb[34].mxu0  ;;  %v8220_v23 = vpop.f32.mrb[34].mxu1 }
 0x597   :  { %v6868_v37 = vpop.f32.mrb[35].mxu0  ;;  %v8221_v1 = vpop.f32.mrb[35].mxu1 }
 0x598   :  { %v8813_v60 = vrot.slane %v9285_v4, %v10881_v40 }
 0x599   :  { %9272 = vmatmul.mubr.msk.bf16.vlgmr.msra.gmra.mrb[140].mxu0 %vm6240_vm4, %v10603_v11 }
 0x59a   :  { %v8814_v29 = vcombine.low %v8806_v30, %v8813_v60  ;;  %8388 = vmatpush1.bf16.msra.mxu0 %v6519_v45  ;;  %8419 = vmatprep.mubr.bf16.mxu0 %v9801_v26 }
 0x59b   :  { %8469 = vmatprep.subr.bf16.mxu0 %v6534_v53 }
 0x59c   :  { %9191 = vst [vmem:[#allocation7 + $0x18] sm:$0xff] %v8814_v29  ;;  %v6904_v6 = vpop.f32.mrb[36].mxu0  ;;  %v10982_v9 = vpop.f32.mrb[36].mxu1 }
 0x59d   :  { %v6906_v32 = vpop.f32.mrb[37].mxu0  ;;  %v10984_v8 = vpop.f32.mrb[37].mxu1 }
 0x59e   :  { %v9286_v24 = vpack.c.bf16 %v6906_v32, %v6904_v6  ;;  %v9320_v19 = vpack.c.bf16 %v10984_v8, %v10982_v9  ;;  %v6908_v38 = vpop.f32.mrb[38].mxu0  ;;  %v8302_v51 = vpop.f32.mrb[38].mxu1 }
 0x59f   :  { %v6909_v52 = vpop.f32.mrb[39].mxu0  ;;  %v8303_v31 = vpop.f32.mrb[39].mxu1 }
 0x5a0   :  { %v8823_v39 = vrot.slane %v9286_v24, %v10881_v40 }
 0x5a1   :  { %9274 = vmatmul.mubr.msk.bf16.vlgmr.msra.gmra.mrb[144].mxu0 %vm6240_vm4, %v10603_v11 }
 0x5a2   :  { %8470 = vmatpush1.bf16.msra.mxu0 %v6531_v49  ;;  %8501 = vmatprep.mubr.bf16.mxu0 %v9801_v26 }
 0x5a4   :  { %v6945_v63 = vpop.f32.mrb[40].mxu0  ;;  %v10993_v18 = vpop.f32.mrb[40].mxu1 }
 0x5a5   :  { %v6947_v7 = vpop.f32.mrb[41].mxu0  ;;  %v10995_v42 = vpop.f32.mrb[41].mxu1 }
 0x5a6   :  { %v9287_v36 = vpack.c.bf16 %v6947_v7, %v6945_v63  ;;  %v9322_v50 = vpack.c.bf16 %v10995_v42, %v10993_v18  ;;  %v6949_v43 = vpop.f32.mrb[42].mxu0  ;;  %v8384_v62 = vpop.f32.mrb[42].mxu1 }
 0x5a7   :  { %v6950_v59 = vpop.f32.mrb[43].mxu0  ;;  %v8385_v3 = vpop.f32.mrb[43].mxu1 }
 0x5a8   :  { %v8830_v14 = vrot.slane %v9287_v36, %v10881_v40 }
 0x5a9   :  { %9276 = vmatmul.mubr.msk.bf16.vlgmr.msra.gmra.mrb[148].mxu0 %vm6240_vm4, %v10603_v11 }
 0x5aa   :  { %v8831_v26 = vcombine.low %v8823_v39, %v8830_v14 }
 0x5ac   :  { %9192 = vst [vmem:[#allocation7 + $0x20] sm:$0xff] %v8831_v26  ;;  %v6986_v22 = vpop.f32.mrb[44].mxu0  ;;  %v11003_v4 = vpop.f32.mrb[44].mxu1 }
 0x5ad   :  { %v6988_v28 = vpop.f32.mrb[45].mxu0  ;;  %v11005_v23 = vpop.f32.mrb[45].mxu1 }
 0x5ae   :  { %v9288_v25 = vpack.c.bf16 %v6988_v28, %v6986_v22  ;;  %v9324_v45 = vpack.c.bf16 %v11005_v23, %v11003_v4  ;;  %v6990_v37 = vpop.f32.mrb[46].mxu0  ;;  %v8466_v1 = vpop.f32.mrb[46].mxu1 }
 0x5af   :  { %v6991_v48 = vpop.f32.mrb[47].mxu0  ;;  %v8467_v53 = vpop.f32.mrb[47].mxu1 }
 0x5b0   :  { %v8840_v49 = vrot.slane %v9288_v25, %v10881_v40 }
 0x5b4   :  { %v7027_v30 = vpop.f32.mrb[48].mxu0  ;;  %v8544_v60 = vpop.f32.mrb[48].mxu1 }
 0x5b5   :  { %v7029_v29 = vpop.f32.mrb[49].mxu0  ;;  %v8546_v11 = vpop.f32.mrb[49].mxu1 }
 0x5b6   :  { %v9289_v6 = vpack.c.bf16 %v7029_v29, %v7027_v30  ;;  %v9326_v32 = vpack.c.bf16 %v8546_v11, %v8544_v60  ;;  %v7031_v24 = vpop.f32.mrb[50].mxu0  ;;  %v8548_v38 = vpop.f32.mrb[50].mxu1 }
 0x5b7   :  { %v7032_v51 = vpop.f32.mrb[51].mxu0  ;;  %v8549_v0 = vpop.f32.mrb[51].mxu1 }
 0x5b8   :  { %v8847_v52 = vrot.slane %v9289_v6, %v10881_v40  ;;  %9327 = vst.sshfl [vmem:[#allocation7 + $0xc0] sm:$0x33 pattern:$0x76325410] %v9326_v32 }
 0x5ba   :  { %v8848_v31 = vcombine.low %v8840_v49, %v8847_v52 }
 0x5bc   :  { %9193 = vst [vmem:[#allocation7 + $0x28] sm:$0xff] %v8848_v31  ;;  %v7068_v63 = vpop.f32.mrb[52].mxu0 }
 0x5bd   :  { %v7070_v7 = vpop.f32.mrb[53].mxu0 }
 0x5be   :  { %v9290_v36 = vpack.c.bf16 %v7070_v7, %v7068_v63  ;;  %v7072_v43 = vpop.f32.mrb[54].mxu0 }
 0x5bf   :  { %v7073_v62 = vpop.f32.mrb[55].mxu0 }
 0x5c0   :  { %v8857_v22 = vrot.slane %v9290_v36, %v10881_v40 }
 0x5c4   :  { %v7109_v59 = vpop.f32.mrb[56].mxu0 }
 0x5c5   :  { %v7111_v3 = vpop.f32.mrb[57].mxu0 }
 0x5c6   :  { %v9291_v39 = vpack.c.bf16 %v7111_v3, %v7109_v59  ;;  %v7113_v14 = vpop.f32.mrb[58].mxu0 }
 0x5c7   :  { %v7114_v26 = vpop.f32.mrb[59].mxu0 }
 0x5c8   :  { %v8864_v28 = vrot.slane %v9291_v39, %v10881_v40 }
 0x5ca   :  { %v8865_v25 = vcombine.low %v8857_v22, %v8864_v28 }
 0x5cc   :  { %9194 = vst [vmem:[#allocation7 + $0x30] sm:$0xff] %v8865_v25  ;;  %v7150_v37 = vpop.f32.mrb[60].mxu0 }
 0x5cd   :  { %v7152_v1 = vpop.f32.mrb[61].mxu0 }
 0x5ce   :  { %v9292_v48 = vpack.c.bf16 %v7152_v1, %v7150_v37  ;;  %v7154_v53 = vpop.f32.mrb[62].mxu0 }
 0x5cf   :  { %v7155_v30 = vpop.f32.mrb[63].mxu0 }
 0x5d0   :  { %v8874_v24 = vrot.slane %v9292_v48, %v10881_v40 }
 0x5d4   :  { %v7191_v60 = vpop.f32.mrb[64].mxu0 }
 0x5d5   :  { %v7193_v29 = vpop.f32.mrb[65].mxu0 }
 0x5d6   :  { %v9293_v11 = vpack.c.bf16 %v7193_v29, %v7191_v60  ;;  %v7195_v6 = vpop.f32.mrb[66].mxu0 }
 0x5d7   :  { %v7196_v32 = vpop.f32.mrb[67].mxu0 }
 0x5d8   :  { %v8881_v38 = vrot.slane %v9293_v11, %v10881_v40 }
 0x5da   :  { %v8882_v51 = vcombine.low %v8874_v24, %v8881_v38 }
 0x5dc   :  { %9195 = vst [vmem:[#allocation7 + $0x38] sm:$0xff] %v8882_v51  ;;  %v7232_v0 = vpop.f32.mrb[68].mxu0 }
 0x5dd   :  { %v7234_v49 = vpop.f32.mrb[69].mxu0 }
 0x5de   :  { %v9294_v52 = vpack.c.bf16 %v7234_v49, %v7232_v0  ;;  %v7236_v31 = vpop.f32.mrb[70].mxu0 }
 0x5df   :  { %v7237_v63 = vpop.f32.mrb[71].mxu0 }
 0x5e0   :  { %v8891_v3 = vrot.slane %v9294_v52, %v10881_v40 }
 0x5e4   :  { %v7273_v7 = vpop.f32.mrb[72].mxu0 }
 0x5e5   :  { %v7275_v36 = vpop.f32.mrb[73].mxu0 }
 0x5e6   :  { %v9295_v43 = vpack.c.bf16 %v7275_v36, %v7273_v7  ;;  %v7277_v62 = vpop.f32.mrb[74].mxu0 }
 0x5e7   :  { %v7278_v59 = vpop.f32.mrb[75].mxu0 }
 0x5e8   :  { %v8898_v39 = vrot.slane %v9295_v43, %v10881_v40 }
 0x5ea   :  { %v8899_v14 = vcombine.low %v8891_v3, %v8898_v39 }
 0x5ec   :  { %9196 = vst [vmem:[#allocation7 + $0x40] sm:$0xff] %v8899_v14  ;;  %v7314_v26 = vpop.f32.mrb[76].mxu0 }
 0x5ed   :  { %v7316_v22 = vpop.f32.mrb[77].mxu0 }
 0x5ee   :  { %v9296_v28 = vpack.c.bf16 %v7316_v22, %v7314_v26  ;;  %v7318_v25 = vpop.f32.mrb[78].mxu0 }
 0x5ef   :  { %v7319_v37 = vpop.f32.mrb[79].mxu0 }
 0x5f0   :  { %v8908_v29 = vrot.slane %v9296_v28, %v10881_v40 }
 0x5f4   :  { %v7355_v1 = vpop.f32.mrb[80].mxu0 }
 0x5f5   :  { %v7357_v48 = vpop.f32.mrb[81].mxu0 }
 0x5f6   :  { %v9297_v53 = vpack.c.bf16 %v7357_v48, %v7355_v1  ;;  %v7359_v30 = vpop.f32.mrb[82].mxu0 }
 0x5f7   :  { %v7360_v60 = vpop.f32.mrb[83].mxu0 }
 0x5f8   :  { %v8915_v11 = vrot.slane %v9297_v53, %v10881_v40 }
 0x5fa   :  { %v8916_v6 = vcombine.low %v8908_v29, %v8915_v11 }
 0x5fc   :  { %9197 = vst [vmem:[#allocation7 + $0x48] sm:$0xff] %v8916_v6  ;;  %v7396_v32 = vpop.f32.mrb[84].mxu0 }
 0x5fd   :  { %v7398_v24 = vpop.f32.mrb[85].mxu0 }
 0x5fe   :  { %v9298_v38 = vpack.c.bf16 %v7398_v24, %v7396_v32  ;;  %v7400_v51 = vpop.f32.mrb[86].mxu0 }
 0x5ff   :  { %v7401_v0 = vpop.f32.mrb[87].mxu0 }
 0x600   :  { %v8925_v36 = vrot.slane %v9298_v38, %v10881_v40 }
 0x604   :  { %v7437_v49 = vpop.f32.mrb[88].mxu0 }
 0x605   :  { %v7439_v52 = vpop.f32.mrb[89].mxu0 }
 0x606   :  { %v9299_v31 = vpack.c.bf16 %v7439_v52, %v7437_v49  ;;  %v7441_v63 = vpop.f32.mrb[90].mxu0 }
 0x607   :  { %v7442_v7 = vpop.f32.mrb[91].mxu0 }
 0x608   :  { %v8932_v43 = vrot.slane %v9299_v31, %v10881_v40 }
 0x60a   :  { %v8933_v62 = vcombine.low %v8925_v36, %v8932_v43 }
 0x60c   :  { %9198 = vst [vmem:[#allocation7 + $0x50] sm:$0xff] %v8933_v62  ;;  %v7478_v59 = vpop.f32.mrb[92].mxu0 }
 0x60d   :  { %v7480_v3 = vpop.f32.mrb[93].mxu0 }
 0x60e   :  { %v9300_v39 = vpack.c.bf16 %v7480_v3, %v7478_v59  ;;  %v7482_v14 = vpop.f32.mrb[94].mxu0  ;;  %v8976_v3 = vrot.slane %v9304_v12, %v10881_v40 }
 0x60f   :  { %v7483_v26 = vpop.f32.mrb[95].mxu0 }
 0x610   :  { %v8942_v48 = vrot.slane %v9300_v39, %v10881_v40 }
 0x614   :  { %v7519_v22 = vpop.f32.mrb[96].mxu0 }
 0x615   :  { %v7521_v28 = vpop.f32.mrb[97].mxu0 }
 0x616   :  { %v9301_v25 = vpack.c.bf16 %v7521_v28, %v7519_v22  ;;  %v7523_v37 = vpop.f32.mrb[98].mxu0 }
 0x617   :  { %v7524_v1 = vpop.f32.mrb[99].mxu0 }
 0x618   :  { %v8949_v53 = vrot.slane %v9301_v25, %v10881_v40  ;;  %v8993_v1 = vrot.slane %v9306_v46, %v10881_v40 }
 0x61a   :  { %v8950_v30 = vcombine.low %v8942_v48, %v8949_v53 }
 0x61c   :  { %9199 = vst [vmem:[#allocation7 + $0x58] sm:$0xff] %v8950_v30  ;;  %v7560_v60 = vpop.f32.mrb[100].mxu0 }
 0x61d   :  { %v7562_v29 = vpop.f32.mrb[101].mxu0 }
 0x61e   :  { %v9302_v11 = vpack.c.bf16 %v7562_v29, %v7560_v60  ;;  %v7564_v6 = vpop.f32.mrb[102].mxu0  ;;  %v9010_v29 = vrot.slane %v9308_v35, %v10881_v40 }
 0x61f   :  { %v7565_v32 = vpop.f32.mrb[103].mxu0 }
 0x620   :  { %v8959_v52 = vrot.slane %v9302_v11, %v10881_v40 }
 0x624   :  { %v7601_v24 = vpop.f32.mrb[104].mxu0 }
 0x625   :  { %v7603_v38 = vpop.f32.mrb[105].mxu0 }
 0x626   :  { %v9303_v51 = vpack.c.bf16 %v7603_v38, %v7601_v24  ;;  %v7605_v0 = vpop.f32.mrb[106].mxu0  ;;  %v9027_v38 = vrot.slane %v9310_v56, %v10881_v40 }
 0x627   :  { %v7606_v49 = vpop.f32.mrb[107].mxu0 }
 0x628   :  { %v8966_v31 = vrot.slane %v9303_v51, %v10881_v40 }
 0x62a   :  { %v8967_v63 = vcombine.low %v8959_v52, %v8966_v31  ;;  %v9044_v31 = vrot.slane %v9312_v16, %v10881_v40 }
 0x62c   :  { %9200 = vst [vmem:[#allocation7 + $0x60] sm:$0xff] %v8967_v63  ;;  %v7683_v7 = vpop.f32.mrb[108].mxu0 }
 0x62d   :  { %v7685_v36 = vpop.f32.mrb[109].mxu0 }
 0x62e   :  { %v9305_v43 = vpack.c.bf16 %v7685_v36, %v7683_v7  ;;  %v7687_v62 = vpop.f32.mrb[110].mxu0 }
 0x62f   :  { %v7688_v59 = vpop.f32.mrb[111].mxu0  ;;  %v9061_v62 = vrot.slane %v9314_v41, %v10881_v40 }
 0x630   :  { %v8983_v39 = vrot.slane %v9305_v43, %v10881_v40 }
 0x632   :  { %v8984_v14 = vcombine.low %v8976_v3, %v8983_v39 }
 0x634   :  { %9201 = vst [vmem:[#allocation7 + $0x68] sm:$0xff] %v8984_v14  ;;  %v7765_v26 = vpop.f32.mrb[112].mxu0 }
 0x635   :  { %v7767_v22 = vpop.f32.mrb[113].mxu0 }
 0x636   :  { %v9307_v28 = vpack.c.bf16 %v7767_v22, %v7765_v26  ;;  %v7769_v25 = vpop.f32.mrb[114].mxu0  ;;  %v9078_v26 = vrot.slane %v9316_v21, %v10881_v40 }
 0x637   :  { %v7770_v37 = vpop.f32.mrb[115].mxu0 }
 0x638   :  { %v9000_v48 = vrot.slane %v9307_v28, %v10881_v40 }
 0x63a   :  { %v9001_v53 = vcombine.low %v8993_v1, %v9000_v48  ;;  %v9095_v1 = vrot.slane %v9318_v33, %v10881_v40 }
 0x63c   :  { %9202 = vst [vmem:[#allocation7 + $0x70] sm:$0xff] %v9001_v53  ;;  %v7847_v55 = vpop.f32.mrb[116].mxu0 }
 0x63d   :  { %v7849_v10 = vpop.f32.mrb[117].mxu0 }
 0x63e   :  { %v9309_v12 = vpack.c.bf16 %v7849_v10, %v7847_v55  ;;  %v7851_v30 = vpop.f32.mrb[118].mxu0 }
 0x63f   :  { %v7852_v60 = vpop.f32.mrb[119].mxu0 }
 0x640   :  { %v9017_v11 = vrot.slane %v9309_v12, %v10881_v40  ;;  %v9112_v12 = vrot.slane %v9320_v19, %v10881_v40 }
 0x642   :  { %v9018_v6 = vcombine.low %v9010_v29, %v9017_v11 }
 0x644   :  { %9203 = vst [vmem:[#allocation7 + $0x78] sm:$0xff] %v9018_v6  ;;  %v7929_v34 = vpop.f32.mrb[120].mxu0  ;;  %v9129_v6 = vrot.slane %v9322_v50, %v10881_v40 }
 0x645   :  { %v7931_v27 = vpop.f32.mrb[121].mxu0 }
 0x646   :  { %v9311_v46 = vpack.c.bf16 %v7931_v27, %v7929_v34  ;;  %v7933_v32 = vpop.f32.mrb[122].mxu0 }
 0x647   :  { %v7934_v24 = vpop.f32.mrb[123].mxu0 }
 0x648   :  { %v9034_v51 = vrot.slane %v9311_v46, %v10881_v40  ;;  %v9146_v24 = vrot.slane %v9324_v45, %v10881_v40 }
 0x64a   :  { %v9035_v0 = vcombine.low %v9027_v38, %v9034_v51 }
 0x64c   :  { %9204 = vst [vmem:[#allocation7 + $0x80] sm:$0xff] %v9035_v0  ;;  %v8011_v20 = vpop.f32.mrb[124].mxu0 }
 0x64d   :  { %v8013_v54 = vpop.f32.mrb[125].mxu0 }
 0x64e   :  { %v9313_v35 = vpack.c.bf16 %v8013_v54, %v8011_v20  ;;  %v8015_v49 = vpop.f32.mrb[126].mxu0 }
 0x64f   :  { %v8016_v52 = vpop.f32.mrb[127].mxu0 }
 0x650   :  { %v9051_v63 = vrot.slane %v9313_v35, %v10881_v40 }
 0x652   :  { %v9052_v7 = vcombine.low %v9044_v31, %v9051_v63 }
 0x654   :  { %9205 = vst [vmem:[#allocation7 + $0x88] sm:$0xff] %v9052_v7  ;;  %v8093_v44 = vpop.f32.mrb[128].mxu0 }
 0x655   :  { %v8095_v17 = vpop.f32.mrb[129].mxu0 }
 0x656   :  { %v9315_v56 = vpack.c.bf16 %v8095_v17, %v8093_v44  ;;  %v8097_v36 = vpop.f32.mrb[130].mxu0 }
 0x657   :  { %v8098_v43 = vpop.f32.mrb[131].mxu0 }
 0x658   :  { %v9068_v59 = vrot.slane %v9315_v56, %v10881_v40 }
 0x65a   :  { %v9069_v3 = vcombine.low %v9061_v62, %v9068_v59 }
 0x65c   :  { %9206 = vst [vmem:[#allocation7 + $0x90] sm:$0xff] %v9069_v3  ;;  %v8175_v47 = vpop.f32.mrb[132].mxu0 }
 0x65d   :  { %v8177_v5 = vpop.f32.mrb[133].mxu0 }
 0x65e   :  { %v9317_v16 = vpack.c.bf16 %v8177_v5, %v8175_v47  ;;  %v8179_v39 = vpop.f32.mrb[134].mxu0 }
 0x65f   :  { %v8180_v14 = vpop.f32.mrb[135].mxu0 }
 0x660   :  { %v9085_v22 = vrot.slane %v9317_v16, %v10881_v40 }
 0x662   :  { %v9086_v28 = vcombine.low %v9078_v26, %v9085_v22 }
 0x664   :  { %9207 = vst [vmem:[#allocation7 + $0x98] sm:$0xff] %v9086_v28  ;;  %v8257_v57 = vpop.f32.mrb[136].mxu0 }
 0x665   :  { %v8259_v58 = vpop.f32.mrb[137].mxu0 }
 0x666   :  { %v9319_v41 = vpack.c.bf16 %v8259_v58, %v8257_v57  ;;  %v8261_v25 = vpop.f32.mrb[138].mxu0 }
 0x667   :  { %v8262_v37 = vpop.f32.mrb[139].mxu0 }
 0x668   :  { %v9102_v48 = vrot.slane %v9319_v41, %v10881_v40 }
 0x66a   :  { %v9103_v53 = vcombine.low %v9095_v1, %v9102_v48 }
 0x66c   :  { %9208 = vst [vmem:[#allocation7 + $0xa0] sm:$0xff] %v9103_v53  ;;  %v8339_v13 = vpop.f32.mrb[140].mxu0 }
 0x66d   :  { %v8341_v2 = vpop.f32.mrb[141].mxu0 }
 0x66e   :  { %v9321_v21 = vpack.c.bf16 %v8341_v2, %v8339_v13  ;;  %v8343_v55 = vpop.f32.mrb[142].mxu0 }
 0x66f   :  { %v8344_v10 = vpop.f32.mrb[143].mxu0 }
 0x670   :  { %v9119_v30 = vrot.slane %v9321_v21, %v10881_v40 }
 0x672   :  { %v9120_v60 = vcombine.low %v9112_v12, %v9119_v30 }
 0x674   :  { %9209 = vst [vmem:[#allocation7 + $0xa8] sm:$0xff] %v9120_v60  ;;  %v8421_v15 = vpop.f32.mrb[144].mxu0 }
 0x675   :  { %v8423_v61 = vpop.f32.mrb[145].mxu0 }
 0x676   :  { %v9323_v33 = vpack.c.bf16 %v8423_v61, %v8421_v15  ;;  %v8425_v29 = vpop.f32.mrb[146].mxu0 }
 0x677   :  { %v8426_v11 = vpop.f32.mrb[147].mxu0 }
 0x678   :  { %v9136_v34 = vrot.slane %v9323_v33, %v10881_v40 }
 0x67a   :  { %v9137_v27 = vcombine.low %v9129_v6, %v9136_v34 }
 0x67c   :  { %9210 = vst [vmem:[#allocation7 + $0xb0] sm:$0xff] %v9137_v27  ;;  %v8503_v9 = vpop.f32.mrb[148].mxu0 }
 0x67d   :  { %v8505_v8 = vpop.f32.mrb[149].mxu0 }
 0x67e   :  { %v9325_v19 = vpack.c.bf16 %v8505_v8, %v8503_v9  ;;  %v8507_v46 = vpop.f32.mrb[150].mxu0 }
 0x67f   :  { %v8508_v32 = vpop.f32.mrb[151].mxu0 }
 0x680   :  { %v9153_v38 = vrot.slane %v9325_v19, %v10881_v40 }
 0x682   :  { %v9154_v18 = vcombine.low %v9146_v24, %v9153_v38 }
 0x684   :  { %9211 = vst [vmem:[#allocation7 + $0xb8] sm:$0xff] %v9154_v18 }
 0x685   :  { %9780 = shalt.err (!%p9777_p6)
}
 0x686   :  { %s9781_s8 = scalar_lea.hbm %s11094_s2, 3136 }
 0x687   :  { %p9782_p7 = scmp.ne.s32.totalorder %s11094_s2, %s9781_s8  ;;  %p9785_p8 = scmp.lt.u32.totalorder %s9781_s8, %s11094_s2 }
 0x689   :  { %p9787_p9 = pnand %p9785_p8, %p9782_p7 }
 0x68b   :  { %9790 = shalt.err (!%p9787_p9)
}
 0x68c   :  { %9222 = dma.vmem_to_hbm [thread:$0]  %s9220_s4, 3136, %s11094_s2, [#allocation4]  }
 0x68d   :  { %9795 = dma.done.wait [#allocation4], 3136  }
 0x68e   :  { %9796 = vsyncadd [#allocation4], 4294964160 }
 0x68f   :  { %9226 = vsyncpa [#allocation3], 1 }
 0x690   :  { %9227 = vsyncpa [#allocation6], 1 }
 0x691   :  { %9228 = vsyncpa [#allocation4], 1 }

</bundles_post_ra>
